<compile_context>
chip_gen: v5e
topology: v5e:2x2
jax: 0.10.0
libtpu: 0.0.40
codegen_flags: <defaults>
</compile_context>

<pallas_src>
import functools

import jax
import jax.numpy as jnp
import numpy as np
from jax import lax
from jax.experimental import pallas as pl
from jax.experimental.pallas import tpu as pltpu

ELEM_LIST_LEN = 23
ATOM_FDIM = ELEM_LIST_LEN + 6 + 5 + 1     # 35
BOND_FDIM = 5                             # 5
MAX_NB = 10

# Padded / tiled sizes (lane dims are multiples of 128).
FEAT_PAD = 128     # pads both ATOM_FDIM (35) and ATOM_FDIM + BOND_FDIM (40)
H_PAD = 128        # hidden (32) padded to a full lane width
TB_TILE = 128      # bonds per PACKED tile (matches v5e MXU; could be 256 on v6e/v7x)
TA_TILE = 128      # atoms per PACKED tile


# ----------------------------------------------------------------------------
# Pallas kernel: one packed tile (several candidates, block-diagonal) per grid step
# ----------------------------------------------------------------------------
def jtmpn_tile_kernel(
    fbonds_ref,      # (TB_TILE, FEAT_PAD)   bf16
    wi_ref,          # (FEAT_PAD, H_PAD)     bf16  == W_i.weight.T (padded)
    tree_msg_ref,    # (TM_PAD, H_PAD)       bf16  (row 0 is the zero padding message)
    badj_tree_ref,   # (TB_TILE, TM_PAD)     bf16  bond -> tree-message count adjacency
    badj_graph_ref,  # (TB_TILE, TB_TILE)    bf16  bond -> bond count adjacency (block-diag)
    wh_ref,          # (H_PAD, H_PAD)        bf16
    fatoms_ref,      # (TA_TILE, FEAT_PAD)   bf16
    aadj_tree_ref,   # (TA_TILE, TM_PAD)     bf16  atom -> tree-message count adjacency
    aadj_graph_ref,  # (TA_TILE, TB_TILE)    bf16  atom -> bond count adjacency (block-diag)
    wo_atom_ref,     # (FEAT_PAD, H_PAD)     bf16  top rows of W_o.weight.T
    wo_nei_ref,      # (H_PAD, H_PAD)        bf16  bottom rows of W_o.weight.T
    bo_ref,          # (8, H_PAD)            f32   row 0 = W_o.bias
    scope_ref,       # (SCOPE_ROWS, TA_TILE) bf16  0/1 atom-membership counts per candidate
    coll_ref,        # (NK_PAD, TB_TILE)     bf16  bond counts per bonds_between_nodes key
    mol_ref,         # out (SCOPE_ROWS, H_PAD) f32  per-candidate atom-hidden SUMS
    coll_out_ref,    # out (NK_PAD, H_PAD)     f32  partial per-key SUMS (reduced outside)
    *,
    depth: int,
):
    f32 = jnp.float32
    bf16 = jnp.bfloat16

    tree_msg = tree_msg_ref[...]                              # (TM_PAD, H_PAD) bf16, tiny

    # binput = W_i(fbonds); graph_message = relu(binput)      (bf16 operands, f32 acc)
    binput = jnp.dot(fbonds_ref[...], wi_ref[...], preferred_element_type=f32)
    gm = jnp.maximum(binput, 0.0).astype(bf16)                # carry in bf16

    # Loop-invariant bond-side tree-message neighbourhood sums (K = TM_PAD, small).
    tree_b = jnp.dot(badj_tree_ref[...], tree_msg, preferred_element_type=f32)

    badj_g = badj_graph_ref[...]
    wh = wh_ref[...]

    # Message-passing loop (depth - 1 iterations, unrolled; bf16 carry).
    def body(_, gm):
        nei = tree_b + jnp.dot(badj_g, gm, preferred_element_type=f32)
        nei = jnp.dot(nei.astype(bf16), wh, preferred_element_type=f32)
        return jnp.maximum(binput + nei, 0.0).astype(bf16)

    gm = lax.fori_loop(0, depth - 1, body, gm, unroll=True)

    # Collated sums over bonds_between_nodes (counts only; 1/len applied in the wrapper,
    # partials summed over tiles outside).
    coll_out_ref[...] = jnp.dot(coll_ref[...], gm, preferred_element_type=f32)

    # Atom-side tree contraction happens AFTER the loop (keeps it out of the loop live set).
    tree_a = jnp.dot(aadj_tree_ref[...], tree_msg, preferred_element_type=f32)
    atom_nei = tree_a + jnp.dot(aadj_graph_ref[...], gm, preferred_element_type=f32)
    ainput_h = (
        jnp.dot(fatoms_ref[...], wo_atom_ref[...], preferred_element_type=f32)
        + jnp.dot(atom_nei.astype(bf16), wo_nei_ref[...], preferred_element_type=f32)
        + bo_ref[0:1, :]
    )
    atom_hiddens = jnp.maximum(ainput_h, 0.0).astype(bf16)

    # Per-candidate atom SUMS (scope holds 0/1 counts; 1/n_atoms applied in the wrapper).
    mol_ref[...] = jnp.dot(scope_ref[...], atom_hiddens, preferred_element_type=f32)


# ----------------------------------------------------------------------------
# Wrapper: grid over packed tiles, lane-dense padded blocks, bf16 operands
# ----------------------------------------------------------------------------
def jtmpn_pallas(
    fbonds_blk, wi_p, tree_msg_p, badj_tree_blk, badj_graph_blk, wh_p,
    fatoms_blk, aadj_tree_blk, aadj_graph_blk, wo_atom_p, wo_nei_p, bo_p,
    scope_blk, coll_blk,
    *, depth, hidden, num_keys, cand_tile, cand_row, inv_atom_counts, inv_key_lens,
):
    num_tiles, tb_tile, feat_pad = fbonds_blk.shape
    ta_tile = fatoms_blk.shape[1]
    h_pad = wi_p.shape[1]
    tm_pad = tree_msg_p.shape[0]
    nk_pad = coll_blk.shape[1]
    scope_rows = scope_blk.shape[1]

    def tile_spec(a):
        zeros = (0,) * (a.ndim - 1)
        return pl.BlockSpec((None,) + a.shape[1:], lambda t: (t,) + zeros)

    def shared_spec(a):
        zeros = (0,) * a.ndim
        return pl.BlockSpec(a.shape, lambda t: zeros)

    in_arrays = (fbonds_blk, wi_p, tree_msg_p, badj_tree_blk, badj_graph_blk, wh_p,
                 fatoms_blk, aadj_tree_blk, aadj_graph_blk, wo_atom_p, wo_nei_p, bo_p,
                 scope_blk, coll_blk)
    is_tile = (True, False, False, True, True, False,
               True, True, True, False, False, False,
               True, True)
    in_specs = [tile_spec(a) if c else shared_spec(a) for a, c in zip(in_arrays, is_tile)]

    out_shape = (
        jax.ShapeDtypeStruct((num_tiles, scope_rows, h_pad), jnp.float32),
        jax.ShapeDtypeStruct((num_tiles, nk_pad, h_pad), jnp.float32),
    )
    out_specs = (
        pl.BlockSpec((None, scope_rows, h_pad), lambda t: (t, 0, 0)),
        pl.BlockSpec((None, nk_pad, h_pad), lambda t: (t, 0, 0)),
    )

    # Advisory cost estimate so XLA can schedule around the custom call.
    flops_per_tile = 2 * (
        tb_tile * feat_pad * h_pad
        + tb_tile * tm_pad * h_pad
        + (depth - 1) * (tb_tile * tb_tile * h_pad + tb_tile * h_pad * h_pad)
        + nk_pad * tb_tile * h_pad
        + ta_tile * tm_pad * h_pad
        + ta_tile * tb_tile * h_pad
        + ta_tile * feat_pad * h_pad
        + ta_tile * h_pad * h_pad
        + scope_rows * ta_tile * h_pad
    )
    bytes_accessed = sum(int(np.prod(a.shape)) * a.dtype.itemsize for a in in_arrays)
    bytes_accessed += sum(int(np.prod(s.shape)) * 4 for s in out_shape)

    mol_out, coll_partial = pl.pallas_call(
        functools.partial(jtmpn_tile_kernel, depth=depth),
        grid=(num_tiles,),
        in_specs=in_specs,
        out_specs=out_specs,
        out_shape=out_shape,
        compiler_params=pltpu.CompilerParams(
            dimension_semantics=("parallel",),        # tiles shard across TCs on v7x
            vmem_limit_bytes=32 * 1024 * 1024,        # huge headroom; safe on v7x 64 MiB
        ),
        cost_estimate=pl.CostEstimate(
            flops=int(num_tiles * flops_per_tile),
            transcendentals=0,
            bytes_accessed=int(bytes_accessed),
        ),
    )(*in_arrays)

    # Normalisation / un-packing (tiny XLA ops, exact in f32).
    mol_vecs = mol_out[cand_tile, cand_row, :hidden] * inv_atom_counts[:, None]
    coll = jnp.sum(coll_partial, axis=0)[:num_keys, :hidden] * inv_key_lens[:, None]
    return mol_vecs, coll


# ----------------------------------------------------------------------------
# Host-side glue: count-adjacency built with numpy scatter-add (no one_hot blowup)
# ----------------------------------------------------------------------------
def build_count_adjacency(idx, total_mess, total_bonds):
    """idx: (N, MAX_NB) indices into concat([tree_message, graph_message])."""
    n = idx.shape[0]
    adj_tree = np.zeros((n, total_mess), np.float32)
    adj_graph = np.zeros((n, total_bonds), np.float32)
    rows = np.repeat(np.arange(n), idx.shape[1])
    flat = idx.reshape(-1)
    is_tree = flat < total_mess
    np.add.at(adj_tree, (rows[is_tree], flat[is_tree]), 1.0)
    np.add.at(adj_graph, (rows[~is_tree], flat[~is_tree] - total_mess), 1.0)
    adj_tree[:, 0] = 0.0   # index 0 is the all-zeros padding message
    return adj_tree, adj_graph


def pad2(x, rows, cols):
    out = np.zeros((rows, cols), np.float32)
    out[: x.shape[0], : x.shape[1]] = x
    return out


# ----------------------------------------------------------------------------
# Pure-JAX f32 reference (gather-based, mirrors the PyTorch code)
# ----------------------------------------------------------------------------
def jtmpn_reference(fbonds, fatoms, agraph, bgraph, tree_message,
                    wi, wh, wo_full, bo, scope, coll_lists, depth):
    binput = fbonds @ wi
    gm = jax.nn.relu(binput)
    for _ in range(depth - 1):
        msg = jnp.concatenate([tree_message, gm], axis=0)
        nei = msg[bgraph].sum(axis=1) @ wh
        gm = jax.nn.relu(binput + nei)
    coll = jnp.stack([gm[jnp.asarray(v)].mean(axis=0) for v in coll_lists], axis=0)
    msg = jnp.concatenate([tree_message, gm], axis=0)
    nei = msg[agraph].sum(axis=1)
    ainput = jnp.concatenate([fatoms, nei], axis=1)
    ah = jax.nn.relu(ainput @ wo_full + bo)
    mol_vecs = jnp.stack([ah[st:st + le].sum(axis=0) / le for st, le in scope], axis=0)
    return mol_vecs, coll


# ----------------------------------------------------------------------------
# Main
# ----------------------------------------------------------------------------
if __name__ == "__main__":
    hidden_size = 32
    depth = 3

    # ---- synthetic candidate batch (sizes typical of JTMPN: ~5-18 atoms/bonds each) ----
    rng = np.random.default_rng(0)
    NC = 16
    cand_atoms = [int(rng.integers(5, 11)) for _ in range(NC)]
    cand_bonds = [int(rng.integers(8, 19)) for _ in range(NC)]
    total_atoms = sum(cand_atoms)
    total_bonds = sum(cand_bonds)
    total_mess = 12                        # includes the all-zeros padding message (row 0)
    atom_off = np.concatenate([[0], np.cumsum(cand_atoms)]).astype(int)
    bond_off = np.concatenate([[0], np.cumsum(cand_bonds)]).astype(int)
    scope = [(int(atom_off[c]), cand_atoms[c]) for c in range(NC)]

    key = jax.random.PRNGKey(0)
    keys = jax.random.split(key, 8)

    # ---- synthetic featurization ----
    # TODO(synk): RDKit atom_features/bond_features and in_bonds/mess_dict bookkeeping stay host-side.
    fatoms_np = np.array(jax.random.uniform(keys[0], (total_atoms, ATOM_FDIM)) < 0.2,
                         dtype=np.float32)
    fbonds_np = np.array(
        jax.random.uniform(keys[1], (total_bonds, ATOM_FDIM + BOND_FDIM)) < 0.2,
        dtype=np.float32)
    tree_message_np = np.array(jax.random.normal(keys[2], (total_mess, hidden_size)),
                               dtype=np.float32)          # np.array -> writable copy
    tree_message_np[0] = 0.0                              # all_mess[0] = zeros

    # ---- synthetic topology: graph-message references never cross candidates ----
    def make_indices(n_rows, bond_start, nb):
        idx = np.zeros((n_rows, MAX_NB), np.int32)
        for r in range(n_rows):
            k = int(rng.integers(1, 7))
            for j in range(k):
                if rng.random() < 0.35:
                    idx[r, j] = int(rng.integers(1, total_mess))
                else:
                    idx[r, j] = total_mess + bond_start + int(rng.integers(0, nb))
        return idx

    bgraph_np = np.concatenate(
        [make_indices(cand_bonds[c], int(bond_off[c]), cand_bonds[c]) for c in range(NC)], 0)
    agraph_np = np.concatenate(
        [make_indices(cand_atoms[c], int(bond_off[c]), cand_bonds[c]) for c in range(NC)], 0)

    coll_keys = [(0, 1), (1, 0), (2, 3)]
    bonds_between_nodes = {}
    for kk in coll_keys:
        n_b = int(rng.integers(2, 5))
        bonds_between_nodes[kk] = [int(rng.integers(0, total_bonds)) for _ in range(n_b)]
    num_keys = len(coll_keys)

    # ---- parameters (PyTorch nn.Linear-style uniform init, stored as weight.T) ----
    def uniform_init(k, shape, fan_in):
        bound = 1.0 / np.sqrt(fan_in)
        return np.array(jax.random.uniform(k, shape, jnp.float32, -bound, bound))

    wi_np = uniform_init(keys[3], (ATOM_FDIM + BOND_FDIM, hidden_size), ATOM_FDIM + BOND_FDIM)
    wh_np = uniform_init(keys[4], (hidden_size, hidden_size), hidden_size)
    wo_np = uniform_init(keys[5], (ATOM_FDIM + hidden_size, hidden_size),
                         ATOM_FDIM + hidden_size)
    bo_np = uniform_init(keys[6], (1, hidden_size), ATOM_FDIM + hidden_size)

    # ---- gathers -> count adjacencies (exact sums), numpy scatter-add ----
    badj_tree_g, badj_graph_g = build_count_adjacency(bgraph_np, total_mess, total_bonds)
    aadj_tree_g, aadj_graph_g = build_count_adjacency(agraph_np, total_mess, total_bonds)

    # Block-diagonal sanity check (guards the packed per-candidate decomposition).
    for c in range(NC):
        b0, b1 = int(bond_off[c]), int(bond_off[c + 1])
        a0, a1 = int(atom_off[c]), int(atom_off[c + 1])
        assert np.all(badj_graph_g[b0:b1, :b0] == 0) and np.all(badj_graph_g[b0:b1, b1:] == 0)
        assert np.all(aadj_graph_g[a0:a1, :b0] == 0) and np.all(aadj_graph_g[a0:a1, b1:] == 0)

    # ---- pack candidates block-diagonally into tiles (greedy, bond/atom capacity) ----
    tiles, cur, cur_b, cur_a = [], [], 0, 0
    for c in range(NC):
        nb, na = cand_bonds[c], cand_atoms[c]
        assert nb <= TB_TILE and na <= TA_TILE, "candidate exceeds tile capacity"
        if cur and (cur_b + nb > TB_TILE or cur_a + na > TA_TILE):
            tiles.append(cur)
            cur, cur_b, cur_a = [], 0, 0
        cur.append(c)
        cur_b += nb
        cur_a += na
    if cur:
        tiles.append(cur)
    num_tiles = len(tiles)

    max_cands_per_tile = max(len(t) for t in tiles)
    SCOPE_ROWS = max(8, -(-max_cands_per_tile // 8) * 8)   # sublane multiple of 8
    NK_PAD = max(8, -(-num_keys // 8) * 8)
    TM_PAD = max(16, -(-total_mess // 16) * 16)            # small K, no 128 blowup
    assert total_mess <= TM_PAD and num_keys <= NK_PAD

    fbonds_blk = np.zeros((num_tiles, TB_TILE, FEAT_PAD), np.float32)
    fatoms_blk = np.zeros((num_tiles, TA_TILE, FEAT_PAD), np.float32)
    badj_tree_blk = np.zeros((num_tiles, TB_TILE, TM_PAD), np.float32)
    aadj_tree_blk = np.zeros((num_tiles, TA_TILE, TM_PAD), np.float32)
    badj_graph_blk = np.zeros((num_tiles, TB_TILE, TB_TILE), np.float32)
    aadj_graph_blk = np.zeros((num_tiles, TA_TILE, TB_TILE), np.float32)
    scope_blk = np.zeros((num_tiles, SCOPE_ROWS, TA_TILE), np.float32)
    coll_blk = np.zeros((num_tiles, NK_PAD, TB_TILE), np.float32)

    cand_tile = np.zeros(NC, np.int32)
    cand_row = np.zeros(NC, np.int32)
    bond_tile = np.zeros(total_bonds, np.int32)
    bond_local = np.zeros(total_bonds, np.int32)

    for t, cands in enumerate(tiles):
        lb, la = 0, 0
        for r, c in enumerate(cands):
            b0, b1 = int(bond_off[c]), int(bond_off[c + 1])
            a0, a1 = int(atom_off[c]), int(atom_off[c + 1])
            nb, na = b1 - b0, a1 - a0
            cand_tile[c], cand_row[c] = t, r
            bond_tile[b0:b1] = t
            bond_local[b0:b1] = lb + np.arange(nb)
            fbonds_blk[t, lb:lb + nb, :ATOM_FDIM + BOND_FDIM] = fbonds_np[b0:b1]
            fatoms_blk[t, la:la + na, :ATOM_FDIM] = fatoms_np[a0:a1]
            badj_tree_blk[t, lb:lb + nb, :total_mess] = badj_tree_g[b0:b1]
            aadj_tree_blk[t, la:la + na, :total_mess] = aadj_tree_g[a0:a1]
            badj_graph_blk[t, lb:lb + nb, lb:lb + nb] = badj_graph_g[b0:b1, b0:b1]
            aadj_graph_blk[t, la:la + na, lb:lb + nb] = aadj_graph_g[a0:a1, b0:b1]
            scope_blk[t, r, la:la + na] = 1.0          # counts; 1/n_atoms applied later
            lb += nb
            la += na

    covered = np.zeros(num_keys, np.int64)
    for r, kk in enumerate(coll_keys):
        for b in bonds_between_nodes[kk]:
            coll_blk[bond_tile[b], r, bond_local[b]] += 1.0   # counts; 1/len applied later
            covered[r] += 1
    for r, kk in enumerate(coll_keys):                 # guard: every listed bond is covered
        assert covered[r] == len(bonds_between_nodes[kk])

    # ---- padded parameters & messages ----
    wi_p = pad2(wi_np, FEAT_PAD, H_PAD)
    wh_p = pad2(wh_np, H_PAD, H_PAD)
    wo_atom_p = pad2(wo_np[:ATOM_FDIM], FEAT_PAD, H_PAD)
    wo_nei_p = pad2(wo_np[ATOM_FDIM:], H_PAD, H_PAD)
    bo_p = pad2(bo_np, 8, H_PAD)
    tree_msg_p = pad2(tree_message_np, TM_PAD, H_PAD)   # row 0 already zero

    bf16, f32 = jnp.bfloat16, jnp.float32
    mol_vecs, coll_vals = jtmpn_pallas(
        jnp.asarray(fbonds_blk, bf16), jnp.asarray(wi_p, bf16), jnp.asarray(tree_msg_p, bf16),
        jnp.asarray(badj_tree_blk, bf16), jnp.asarray(badj_graph_blk, bf16),
        jnp.asarray(wh_p, bf16), jnp.asarray(fatoms_blk, bf16),
        jnp.asarray(aadj_tree_blk, bf16), jnp.asarray(aadj_graph_blk, bf16),
        jnp.asarray(wo_atom_p, bf16), jnp.asarray(wo_nei_p, bf16), jnp.asarray(bo_p, f32),
        jnp.asarray(scope_blk, bf16), jnp.asarray(coll_blk, bf16),
        depth=depth, hidden=hidden_size, num_keys=num_keys,
        cand_tile=jnp.asarray(cand_tile), cand_row=jnp.asarray(cand_row),
        inv_atom_counts=jnp.asarray(1.0 / np.asarray(cand_atoms, np.float32)),
        inv_key_lens=jnp.asarray(
            [1.0 / len(bonds_between_nodes[kk]) for kk in coll_keys], np.float32),
    )
    mol_vecs = jax.block_until_ready(mol_vecs)
    coll_vals = jax.block_until_ready(coll_vals)
    collated = {kk: coll_vals[r] for r, kk in enumerate(coll_keys)}

    # ---- validate against the gather-based f32 reference (bf16 kernel -> loose tol) ----
    ref_mol, ref_coll = jtmpn_reference(
        jnp.asarray(fbonds_np), jnp.asarray(fatoms_np),
        jnp.asarray(agraph_np), jnp.asarray(bgraph_np), jnp.asarray(tree_message_np),
        jnp.asarray(wi_np), jnp.asarray(wh_np), jnp.asarray(wo_np), jnp.asarray(bo_np),
        scope, [bonds_between_nodes[kk] for kk in coll_keys], depth)

    np.testing.assert_allclose(np.asarray(mol_vecs), np.asarray(ref_mol),
                               rtol=1e-1, atol=1e-1)
    np.testing.assert_allclose(np.asarray(coll_vals), np.asarray(ref_coll),
                               rtol=1e-1, atol=1e-1)
    assert mol_vecs.shape == (NC, hidden_size)
    assert len(collated) == num_keys
    assert num_tiles >= 2   # keeps the grid shardable across both v7x TensorCores

    print("KERNEL_OK")
</pallas_src>

<mosaic_0001>
module attributes {stable_mosaic.version = 11 : i64} {
  func.func @jtmpn_tile_kernel(%arg0: i32, %arg1: memref<1x128x128xbf16, #tpu.memory_space<vmem>>, %arg2: memref<128x128xbf16, #tpu.memory_space<vmem>>, %arg3: memref<16x128xbf16, #tpu.memory_space<vmem>>, %arg4: memref<1x128x16xbf16, #tpu.memory_space<vmem>>, %arg5: memref<1x128x128xbf16, #tpu.memory_space<vmem>>, %arg6: memref<128x128xbf16, #tpu.memory_space<vmem>>, %arg7: memref<1x128x128xbf16, #tpu.memory_space<vmem>>, %arg8: memref<1x128x16xbf16, #tpu.memory_space<vmem>>, %arg9: memref<1x128x128xbf16, #tpu.memory_space<vmem>>, %arg10: memref<128x128xbf16, #tpu.memory_space<vmem>>, %arg11: memref<128x128xbf16, #tpu.memory_space<vmem>>, %arg12: memref<8x128xf32, #tpu.memory_space<vmem>>, %arg13: memref<1x16x128xbf16, #tpu.memory_space<vmem>>, %arg14: memref<1x8x128xbf16, #tpu.memory_space<vmem>>, %arg15: memref<1x16x128xf32, #tpu.memory_space<vmem>>, %arg16: memref<1x8x128xf32, #tpu.memory_space<vmem>>) attributes {dimension_semantics = [#tpu.dimension_semantics<parallel>], iteration_bounds = array<i64: 2>, scalar_prefetch = 0 : i64, scratch_operands = 0 : i64, tpu.core_type = #tpu.core_type<tc>, window_params = [{transform_indices = @transform_0, window_bounds = array<i64: 1, 128, 128>}, {pipeline_mode = #tpu.pipeline_mode<synchronous>, transform_indices = @transform_1, window_bounds = array<i64: 128, 128>}, {pipeline_mode = #tpu.pipeline_mode<synchronous>, transform_indices = @transform_2, window_bounds = array<i64: 16, 128>}, {transform_indices = @transform_3, window_bounds = array<i64: 1, 128, 16>}, {transform_indices = @transform_4, window_bounds = array<i64: 1, 128, 128>}, {pipeline_mode = #tpu.pipeline_mode<synchronous>, transform_indices = @transform_5, window_bounds = array<i64: 128, 128>}, {transform_indices = @transform_6, window_bounds = array<i64: 1, 128, 128>}, {transform_indices = @transform_7, window_bounds = array<i64: 1, 128, 16>}, {transform_indices = @transform_8, window_bounds = array<i64: 1, 128, 128>}, {pipeline_mode = #tpu.pipeline_mode<synchronous>, transform_indices = @transform_9, window_bounds = array<i64: 128, 128>}, {pipeline_mode = #tpu.pipeline_mode<synchronous>, transform_indices = @transform_10, window_bounds = array<i64: 128, 128>}, {pipeline_mode = #tpu.pipeline_mode<synchronous>, transform_indices = @transform_11, window_bounds = array<i64: 8, 128>}, {transform_indices = @transform_12, window_bounds = array<i64: 1, 16, 128>}, {transform_indices = @transform_13, window_bounds = array<i64: 1, 8, 128>}, {transform_indices = @transform_14, window_bounds = array<i64: 1, 16, 128>}, {transform_indices = @transform_15, window_bounds = array<i64: 1, 8, 128>}]} {
    %c0 = arith.constant 0 : index
    %c0_0 = arith.constant 0 : index
    %0 = vector.load %arg3[%c0, %c0_0] : memref<16x128xbf16, #tpu.memory_space<vmem>>, vector<16x128xbf16>
    %c0_1 = arith.constant 0 : index
    %c0_2 = arith.constant 0 : index
    %c0_3 = arith.constant 0 : index
    %1 = vector.load %arg1[%c0_1, %c0_2, %c0_3] : memref<1x128x128xbf16, #tpu.memory_space<vmem>>, vector<1x128x128xbf16>
    %2 = vector.shape_cast %1 : vector<1x128x128xbf16> to vector<128x128xbf16>
    %c0_4 = arith.constant 0 : index
    %c0_5 = arith.constant 0 : index
    %3 = vector.load %arg2[%c0_4, %c0_5] : memref<128x128xbf16, #tpu.memory_space<vmem>>, vector<128x128xbf16>
    %cst = arith.constant dense<0.000000e+00> : vector<128x128xf32>
    %4 = tpu.matmul %2, %3, %cst {dimension_numbers = #tpu.dot_dimension_numbers<[1], [0], [0], [1], [0, 0, 1, 1], [], []>} : vector<128x128xbf16>, vector<128x128xbf16>, vector<128x128xf32> -> vector<128x128xf32>
    %cst_6 = arith.constant 0.000000e+00 : f32
    %5 = vector.broadcast %cst_6 : f32 to vector<128x128xf32>
    %6 = arith.maximumf %4, %5 : vector<128x128xf32>
    %7 = arith.truncf %6 : vector<128x128xf32> to vector<128x128xbf16>
    %c0_7 = arith.constant 0 : index
    %c0_8 = arith.constant 0 : index
    %c0_9 = arith.constant 0 : index
    %8 = vector.load %arg4[%c0_7, %c0_8, %c0_9] : memref<1x128x16xbf16, #tpu.memory_space<vmem>>, vector<1x128x16xbf16>
    %9 = vector.shape_cast %8 : vector<1x128x16xbf16> to vector<128x16xbf16>
    %cst_10 = arith.constant dense<0.000000e+00> : vector<128x128xf32>
    %10 = tpu.matmul %9, %0, %cst_10 {dimension_numbers = #tpu.dot_dimension_numbers<[1], [0], [0], [1], [0, 0, 1, 1], [], []>} : vector<128x16xbf16>, vector<16x128xbf16>, vector<128x128xf32> -> vector<128x128xf32>
    %c0_11 = arith.constant 0 : index
    %c0_12 = arith.constant 0 : index
    %c0_13 = arith.constant 0 : index
    %11 = vector.load %arg5[%c0_11, %c0_12, %c0_13] : memref<1x128x128xbf16, #tpu.memory_space<vmem>>, vector<1x128x128xbf16>
    %12 = vector.shape_cast %11 : vector<1x128x128xbf16> to vector<128x128xbf16>
    %c0_14 = arith.constant 0 : index
    %c0_15 = arith.constant 0 : index
    %13 = vector.load %arg6[%c0_14, %c0_15] : memref<128x128xbf16, #tpu.memory_space<vmem>>, vector<128x128xbf16>
    %c0_i32 = arith.constant 0 : i32
    %cst_16 = arith.constant dense<0.000000e+00> : vector<128x128xf32>
    %14 = tpu.matmul %12, %7, %cst_16 {dimension_numbers = #tpu.dot_dimension_numbers<[1], [0], [0], [1], [0, 0, 1, 1], [], []>} : vector<128x128xbf16>, vector<128x128xbf16>, vector<128x128xf32> -> vector<128x128xf32>
    %15 = arith.addf %10, %14 : vector<128x128xf32>
    %16 = arith.truncf %15 : vector<128x128xf32> to vector<128x128xbf16>
    %cst_17 = arith.constant dense<0.000000e+00> : vector<128x128xf32>
    %17 = tpu.matmul %16, %13, %cst_17 {dimension_numbers = #tpu.dot_dimension_numbers<[1], [0], [0], [1], [0, 0, 1, 1], [], []>} : vector<128x128xbf16>, vector<128x128xbf16>, vector<128x128xf32> -> vector<128x128xf32>
    %18 = arith.addf %4, %17 : vector<128x128xf32>
    %cst_18 = arith.constant 0.000000e+00 : f32
    %19 = vector.broadcast %cst_18 : f32 to vector<128x128xf32>
    %20 = arith.maximumf %18, %19 : vector<128x128xf32>
    %21 = arith.truncf %20 : vector<128x128xf32> to vector<128x128xbf16>
    %c1_i32 = arith.constant 1 : i32
    %cst_19 = arith.constant dense<0.000000e+00> : vector<128x128xf32>
    %22 = tpu.matmul %12, %21, %cst_19 {dimension_numbers = #tpu.dot_dimension_numbers<[1], [0], [0], [1], [0, 0, 1, 1], [], []>} : vector<128x128xbf16>, vector<128x128xbf16>, vector<128x128xf32> -> vector<128x128xf32>
    %23 = arith.addf %10, %22 : vector<128x128xf32>
    %24 = arith.truncf %23 : vector<128x128xf32> to vector<128x128xbf16>
    %cst_20 = arith.constant dense<0.000000e+00> : vector<128x128xf32>
    %25 = tpu.matmul %24, %13, %cst_20 {dimension_numbers = #tpu.dot_dimension_numbers<[1], [0], [0], [1], [0, 0, 1, 1], [], []>} : vector<128x128xbf16>, vector<128x128xbf16>, vector<128x128xf32> -> vector<128x128xf32>
    %26 = arith.addf %4, %25 : vector<128x128xf32>
    %cst_21 = arith.constant 0.000000e+00 : f32
    %27 = vector.broadcast %cst_21 : f32 to vector<128x128xf32>
    %28 = arith.maximumf %26, %27 : vector<128x128xf32>
    %29 = arith.truncf %28 : vector<128x128xf32> to vector<128x128xbf16>
    %c0_22 = arith.constant 0 : index
    %c0_23 = arith.constant 0 : index
    %c0_24 = arith.constant 0 : index
    %30 = vector.load %arg14[%c0_22, %c0_23, %c0_24] : memref<1x8x128xbf16, #tpu.memory_space<vmem>>, vector<1x8x128xbf16>
    %31 = vector.shape_cast %30 : vector<1x8x128xbf16> to vector<8x128xbf16>
    %cst_25 = arith.constant dense<0.000000e+00> : vector<8x128xf32>
    %32 = tpu.matmul %31, %29, %cst_25 {dimension_numbers = #tpu.dot_dimension_numbers<[1], [0], [0], [1], [0, 0, 1, 1], [], []>} : vector<8x128xbf16>, vector<128x128xbf16>, vector<8x128xf32> -> vector<8x128xf32>
    %c0_26 = arith.constant 0 : index
    %c0_27 = arith.constant 0 : index
    %c0_28 = arith.constant 0 : index
    %33 = vector.load %arg16[%c0_26, %c0_27, %c0_28] : memref<1x8x128xf32, #tpu.memory_space<vmem>>, vector<1x8x128xf32>
    %34 = vector.shape_cast %33 : vector<1x8x128xf32> to vector<8x128xf32>
    %35 = vector.shape_cast %32 : vector<8x128xf32> to vector<1x8x128xf32>
    tpu.vector_store %arg16[%c0_26, %c0_27, %c0_28], %35 {strides = array<i32>} : memref<1x8x128xf32, #tpu.memory_space<vmem>>, vector<1x8x128xf32>,
    %c0_29 = arith.constant 0 : index
    %c0_30 = arith.constant 0 : index
    %c0_31 = arith.constant 0 : index
    %36 = vector.load %arg8[%c0_29, %c0_30, %c0_31] : memref<1x128x16xbf16, #tpu.memory_space<vmem>>, vector<1x128x16xbf16>
    %37 = vector.shape_cast %36 : vector<1x128x16xbf16> to vector<128x16xbf16>
    %cst_32 = arith.constant dense<0.000000e+00> : vector<128x128xf32>
    %38 = tpu.matmul %37, %0, %cst_32 {dimension_numbers = #tpu.dot_dimension_numbers<[1], [0], [0], [1], [0, 0, 1, 1], [], []>} : vector<128x16xbf16>, vector<16x128xbf16>, vector<128x128xf32> -> vector<128x128xf32>
    %c0_33 = arith.constant 0 : index
    %c0_34 = arith.constant 0 : index
    %c0_35 = arith.constant 0 : index
    %39 = vector.load %arg9[%c0_33, %c0_34, %c0_35] : memref<1x128x128xbf16, #tpu.memory_space<vmem>>, vector<1x128x128xbf16>
    %40 = vector.shape_cast %39 : vector<1x128x128xbf16> to vector<128x128xbf16>
    %cst_36 = arith.constant dense<0.000000e+00> : vector<128x128xf32>
    %41 = tpu.matmul %40, %29, %cst_36 {dimension_numbers = #tpu.dot_dimension_numbers<[1], [0], [0], [1], [0, 0, 1, 1], [], []>} : vector<128x128xbf16>, vector<128x128xbf16>, vector<128x128xf32> -> vector<128x128xf32>
    %42 = arith.addf %38, %41 : vector<128x128xf32>
    %c0_37 = arith.constant 0 : index
    %c0_38 = arith.constant 0 : index
    %c0_39 = arith.constant 0 : index
    %43 = vector.load %arg7[%c0_37, %c0_38, %c0_39] : memref<1x128x128xbf16, #tpu.memory_space<vmem>>, vector<1x128x128xbf16>
    %44 = vector.shape_cast %43 : vector<1x128x128xbf16> to vector<128x128xbf16>
    %c0_40 = arith.constant 0 : index
    %c0_41 = arith.constant 0 : index
    %45 = vector.load %arg10[%c0_40, %c0_41] : memref<128x128xbf16, #tpu.memory_space<vmem>>, vector<128x128xbf16>
    %cst_42 = arith.constant dense<0.000000e+00> : vector<128x128xf32>
    %46 = tpu.matmul %44, %45, %cst_42 {dimension_numbers = #tpu.dot_dimension_numbers<[1], [0], [0], [1], [0, 0, 1, 1], [], []>} : vector<128x128xbf16>, vector<128x128xbf16>, vector<128x128xf32> -> vector<128x128xf32>
    %47 = arith.truncf %42 : vector<128x128xf32> to vector<128x128xbf16>
    %c0_43 = arith.constant 0 : index
    %c0_44 = arith.constant 0 : index
    %48 = vector.load %arg11[%c0_43, %c0_44] : memref<128x128xbf16, #tpu.memory_space<vmem>>, vector<128x128xbf16>
    %cst_45 = arith.constant dense<0.000000e+00> : vector<128x128xf32>
    %49 = tpu.matmul %47, %48, %cst_45 {dimension_numbers = #tpu.dot_dimension_numbers<[1], [0], [0], [1], [0, 0, 1, 1], [], []>} : vector<128x128xbf16>, vector<128x128xbf16>, vector<128x128xf32> -> vector<128x128xf32>
    %50 = arith.addf %46, %49 : vector<128x128xf32>
    %c0_46 = arith.constant 0 : index
    %c0_47 = arith.constant 0 : index
    %51 = vector.load %arg12[%c0_46, %c0_47] : memref<8x128xf32, #tpu.memory_space<vmem>>, vector<1x128xf32>
    %52 = vector.broadcast %51 : vector<1x128xf32> to vector<128x128xf32>
    %53 = arith.addf %50, %52 : vector<128x128xf32>
    %cst_48 = arith.constant 0.000000e+00 : f32
    %54 = vector.broadcast %cst_48 : f32 to vector<128x128xf32>
    %55 = arith.maximumf %53, %54 : vector<128x128xf32>
    %56 = arith.truncf %55 : vector<128x128xf32> to vector<128x128xbf16>
    %c0_49 = arith.constant 0 : index
    %c0_50 = arith.constant 0 : index
    %c0_51 = arith.constant 0 : index
    %57 = vector.load %arg13[%c0_49, %c0_50, %c0_51] : memref<1x16x128xbf16, #tpu.memory_space<vmem>>, vector<1x16x128xbf16>
    %58 = vector.shape_cast %57 : vector<1x16x128xbf16> to vector<16x128xbf16>
    %cst_52 = arith.constant dense<0.000000e+00> : vector<16x128xf32>
    %59 = tpu.matmul %58, %56, %cst_52 {dimension_numbers = #tpu.dot_dimension_numbers<[1], [0], [0], [1], [0, 0, 1, 1], [], []>} : vector<16x128xbf16>, vector<128x128xbf16>, vector<16x128xf32> -> vector<16x128xf32>
    %c0_53 = arith.constant 0 : index
    %c0_54 = arith.constant 0 : index
    %c0_55 = arith.constant 0 : index
    %60 = vector.load %arg15[%c0_53, %c0_54, %c0_55] : memref<1x16x128xf32, #tpu.memory_space<vmem>>, vector<1x16x128xf32>
    %61 = vector.shape_cast %60 : vector<1x16x128xf32> to vector<16x128xf32>
    %62 = vector.shape_cast %59 : vector<16x128xf32> to vector<1x16x128xf32>
    tpu.vector_store %arg15[%c0_53, %c0_54, %c0_55], %62 {strides = array<i32>} : memref<1x16x128xf32, #tpu.memory_space<vmem>>, vector<1x16x128xf32>,
    return
  }
  func.func @transform_0(%arg0: i32) -> (i32, i32, i32) {
    %c0_i32 = arith.constant 0 : i32
    %c0_i32_0 = arith.constant 0 : i32
    %c0_i32_1 = arith.constant 0 : i32
    return %arg0, %c0_i32, %c0_i32_0 : i32, i32, i32
  }
  func.func @transform_1(%arg0: i32) -> (i32, i32) {
    %c0_i32 = arith.constant 0 : i32
    %c0_i32_0 = arith.constant 0 : i32
    %c0_i32_1 = arith.constant 0 : i32
    return %c0_i32, %c0_i32_0 : i32, i32
  }
  func.func @transform_2(%arg0: i32) -> (i32, i32) {
    %c0_i32 = arith.constant 0 : i32
    %c0_i32_0 = arith.constant 0 : i32
    %c0_i32_1 = arith.constant 0 : i32
    return %c0_i32, %c0_i32_0 : i32, i32
  }
  func.func @transform_3(%arg0: i32) -> (i32, i32, i32) {
    %c0_i32 = arith.constant 0 : i32
    %c0_i32_0 = arith.constant 0 : i32
    %c0_i32_1 = arith.constant 0 : i32
    return %arg0, %c0_i32, %c0_i32_0 : i32, i32, i32
  }
  func.func @transform_4(%arg0: i32) -> (i32, i32, i32) {
    %c0_i32 = arith.constant 0 : i32
    %c0_i32_0 = arith.constant 0 : i32
    %c0_i32_1 = arith.constant 0 : i32
    return %arg0, %c0_i32, %c0_i32_0 : i32, i32, i32
  }
  func.func @transform_5(%arg0: i32) -> (i32, i32) {
    %c0_i32 = arith.constant 0 : i32
    %c0_i32_0 = arith.constant 0 : i32
    %c0_i32_1 = arith.constant 0 : i32
    return %c0_i32, %c0_i32_0 : i32, i32
  }
  func.func @transform_6(%arg0: i32) -> (i32, i32, i32) {
    %c0_i32 = arith.constant 0 : i32
    %c0_i32_0 = arith.constant 0 : i32
    %c0_i32_1 = arith.constant 0 : i32
    return %arg0, %c0_i32, %c0_i32_0 : i32, i32, i32
  }
  func.func @transform_7(%arg0: i32) -> (i32, i32, i32) {
    %c0_i32 = arith.constant 0 : i32
    %c0_i32_0 = arith.constant 0 : i32
    %c0_i32_1 = arith.constant 0 : i32
    return %arg0, %c0_i32, %c0_i32_0 : i32, i32, i32
  }
  func.func @transform_8(%arg0: i32) -> (i32, i32, i32) {
    %c0_i32 = arith.constant 0 : i32
    %c0_i32_0 = arith.constant 0 : i32
    %c0_i32_1 = arith.constant 0 : i32
    return %arg0, %c0_i32, %c0_i32_0 : i32, i32, i32
  }
  func.func @transform_9(%arg0: i32) -> (i32, i32) {
    %c0_i32 = arith.constant 0 : i32
    %c0_i32_0 = arith.constant 0 : i32
    %c0_i32_1 = arith.constant 0 : i32
    return %c0_i32, %c0_i32_0 : i32, i32
  }
  func.func @transform_10(%arg0: i32) -> (i32, i32) {
    %c0_i32 = arith.constant 0 : i32
    %c0_i32_0 = arith.constant 0 : i32
    %c0_i32_1 = arith.constant 0 : i32
    return %c0_i32, %c0_i32_0 : i32, i32
  }
  func.func @transform_11(%arg0: i32) -> (i32, i32) {
    %c0_i32 = arith.constant 0 : i32
    %c0_i32_0 = arith.constant 0 : i32
    %c0_i32_1 = arith.constant 0 : i32
    return %c0_i32, %c0_i32_0 : i32, i32
  }
  func.func @transform_12(%arg0: i32) -> (i32, i32, i32) {
    %c0_i32 = arith.constant 0 : i32
    %c0_i32_0 = arith.constant 0 : i32
    %c0_i32_1 = arith.constant 0 : i32
    return %arg0, %c0_i32, %c0_i32_0 : i32, i32, i32
  }
  func.func @transform_13(%arg0: i32) -> (i32, i32, i32) {
    %c0_i32 = arith.constant 0 : i32
    %c0_i32_0 = arith.constant 0 : i32
    %c0_i32_1 = arith.constant 0 : i32
    return %arg0, %c0_i32, %c0_i32_0 : i32, i32, i32
  }
  func.func @transform_14(%arg0: i32) -> (i32, i32, i32) {
    %c0_i32 = arith.constant 0 : i32
    %c0_i32_0 = arith.constant 0 : i32
    %c0_i32_1 = arith.constant 0 : i32
    return %arg0, %c0_i32, %c0_i32_0 : i32, i32, i32
  }
  func.func @transform_15(%arg0: i32) -> (i32, i32, i32) {
    %c0_i32 = arith.constant 0 : i32
    %c0_i32_0 = arith.constant 0 : i32
    %c0_i32_1 = arith.constant 0 : i32
    return %arg0, %c0_i32, %c0_i32_0 : i32, i32, i32
  }
}

</mosaic_0001>

<bundles_post_ra>
// kernel: tpu_custom_call.1
= control target key start
LH: loop header
LB: loop body
LE: loop exit
PB: predicated region body
PF: predicated region fallthrough
CT: control target
= control target key end

     0   :  { %s4105_s0 = inlined_call_operand.vmem [shape: bf16[2,128,128], index: 0, kind: input, shape index: {}]   ;;  %s4106_s1 = inlined_call_operand.hbm [shape: bf16[128,128], index: 1, kind: input, shape index: {}]   ;;  %s4107_s2 = inlined_call_operand.hbm [shape: bf16[16,128], index: 2, kind: input, shape index: {}]   ;;  %s4108_s3 = inlined_call_operand.vmem [shape: bf16[2,128,16], index: 3, kind: input, shape index: {}]   ;;  %s4109_s4 = inlined_call_operand.vmem [shape: bf16[2,128,128], index: 4, kind: input, shape index: {}]   ;;  %s4110_s5 = inlined_call_operand.hbm [shape: bf16[128,128], index: 5, kind: input, shape index: {}]   ;;  %s4111_s6 = inlined_call_operand.hbm [shape: bf16[2,128,128], index: 6, kind: input, shape index: {}]   ;;  %s4112_s7 = inlined_call_operand.vmem [shape: bf16[2,128,16], index: 7, kind: input, shape index: {}]   ;;  %s4113_s8 = inlined_call_operand.hbm [shape: bf16[2,128,128], index: 8, kind: input, shape index: {}]   ;;  %s4114_s9 = inlined_call_operand.hbm [shape: bf16[128,128], index: 9, kind: input, shape index: {}]   ;;  %s4115_s10 = inlined_call_operand.hbm [shape: bf16[128,128], index: 10, kind: input, shape index: {}]   ;;  %s4116_s11 = inlined_call_operand.hbm [shape: f32[8,128], index: 11, kind: input, shape index: {}]   ;;  %s4117_s12 = inlined_call_operand.vmem [shape: bf16[2,16,128], index: 12, kind: input, shape index: {}]   ;;  %s4118_s13 = inlined_call_operand.vmem [shape: bf16[2,8,128], index: 13, kind: input, shape index: {}]   ;;  %s4119_s14 = inlined_call_operand.hbm [shape: f32[2,16,128], index: 14, kind: output, shape index: {0}]   ;;  %s4120_s15 = inlined_call_operand.hbm [shape: f32[2,8,128], index: 15, kind: output, shape index: {1}]  }
   0x1   :  { %4143 = sst [smem:[#allocation40_spill]] %s4107_s2 }
   0x2   :  { %4144 = sst [smem:[#allocation41_spill]] %s4111_s6 }
   0x3   :  { %4145 = sst [smem:[#allocation42_spill]] %s4112_s7 }
   0x4   :  { %4146 = sst [smem:[#allocation43_spill]] %s4114_s9 }
   0x5   :  { %4147 = sst [smem:[#allocation44_spill]] %s4117_s12 }
   0x6   :  { %4148 = sst [smem:[#allocation45_spill]] %s4119_s14 }
   0x7   :  { %4149 = sst [smem:[#allocation46_spill]] %s4120_s15 }
   0x8   :  { %21 = vsyncpa [#allocation3], 0 }
   0x9   :  { %22 = vsyncpa [#allocation6], 0 }
   0xa   :  { %23 = vsyncpa [#allocation9], 0 }
   0xb   :  { %25 = vsyncpa [#allocation9 + $0x1], 0 }
   0xc   :  { %26 = vsyncpa [#allocation12], 0 }
   0xd   :  { %27 = vsyncpa [#allocation15], 0 }
   0xe   :  { %28 = vsyncpa [#allocation4], 0 }
   0xf   :  { %30 = vsyncpa [#allocation4 + $0x1], 0 }
  0x10   :  { %31 = vsyncpa [#allocation18], 0 }
  0x11   :  { %33 = vsyncpa [#allocation18 + $0x1], 0  ;;  %s3541_s18 = smov 0   ;;  %s3543_s19 = smov 0  }
  0x12   :  { %s3545_s20 = smov 0   ;;  %s3547_s21 = smov 0  }
  0x13 LB: > { %4150 = sst [smem:[#allocation26_spill]] %s3437_s18  ;;  %s3562_s22 = sadd.s32 4294967295, %s3449_s21   ;;  %s3449_s21 = sphi %s3547_s21, %s4202_s21   ;;  %s3445_s20 = sphi %s3545_s20, %s4204_s20   ;;  %s3441_s19 = sphi %s3543_s19, %s4206_s19   ;;  %s3437_s18 = sphi %s3541_s18, %s4205_s18  }
  0x14   : > { %4151 = sst [smem:[#allocation27_spill]] %s3445_s20  ;;  %p2487_p0 = scmp.ge.s32.totalorder %s3449_s21, 1 }
  0x15   : > { %4152 = sst [smem:[#allocation28_spill]] %s3449_s21  ;;  %p4135_p1 = scmp.eq.s32.totalorder %s3562_s22, 0 }
  0x16   : > { %p430_p2 = scmp.lt.s32.totalorder %s3449_s21, 3  ;;  %s4153_s2 = sld [smem:[#allocation40_spill]] }
  0x17   : > { %s3451_s27 = smov [#allocation5]   ;;  %s4155_s9 = sld [smem:[#allocation43_spill]] }
  0x18   : > { %p3570_p3 = pnand %p2487_p0, %p430_p2  ;;  %s457_s28 = sshll.u32 %s3451_s27, 4  ;;  %s458_s28 = int_to_ptr.vmem [resolvable:$true] %s457_s28 }
  0x19   : > { %s3452_s23 = smov [#allocation11]   ;;  %s4121_s27 = smov 64  }
  0x1a   : > { %p3005_p5 = pneg %p3570_p3  ;;  %s485_s24 = sshll.u32 %s3452_s23, 4  ;;  %s486_s24 = int_to_ptr.vmem [resolvable:$true] %s485_s24 }
  0x1b   : > { %s4123_s29 = smov 4   ;;  %s2486_s30 = sadd.s32 4294967294, %s3449_s21  }
  0x1c   : > { %s455_s25 = sshll.u32 %s4153_s2, 4  ;;  %p3582_p6 = pnand %p3005_p5, %p4135_p1  ;;  %s456_s25 = int_to_ptr.hbm [resolvable:$true] %s455_s25 }
  0x1d   : > { %s483_s16 = sshll.u32 %s4155_s9, 4  ;;  %s3598_s2 = sadd.s32 1, %s3449_s21   ;;  %s484_s16 = int_to_ptr.hbm [resolvable:$true] %s483_s16 }
  0x1e   : > { %3011 = dma.hbm_to_vmem [thread:$0]  (!%p3582_p6), %s456_s25, 128, %s458_s28, [#allocation6], %s4121_s27, %s4121_s27, %s4123_s29  }
  0x1f   : > { %3017 = dma.hbm_to_vmem [thread:$0]  (!%p3582_p6), %s484_s16, 1024, %s486_s24, [#allocation12], %s4121_s27, %s4121_s27, %s4123_s29  }
  0x20   : > { %4157 = sst [smem:[#allocation29_spill]] %s3598_s2  ;;  %s184_s23 = ssub.s32 %s3449_s21, %s3598_s2 }
  0x21   : > { %s187_s9 = sadd.s32 1, %s3445_s20  ;;  %p185_p7 = scmp.eq.s32.totalorder %s184_s23, 0 }
  0x22   : > { %p194_p8 = scmp.ne.s32.totalorder %s3445_s20, %s3441_s19  ;;  %p195_p9 = scmp.eq.s32.totalorder %s3449_s21, 0 }
  0x23   : > { %p200_p10 = scmp.ne.s32.totalorder %s3441_s19, %s3437_s18  ;;  %p391_p12 = scmp.eq.s32.totalorder %s3562_s22, 1 }
  0x24   : > { %s3609_s25 = scalar_select %p185_p7, %s3445_s20, %s187_s9  }
  0x25   : > { %p3613_p11 = por %p4135_p1, %p200_p10  ;;  %p397_p13 = scmp.eq.s32.totalorder %s2486_s30, 1 }
  0x26   : > { %4158 = sst [smem:[#allocation30_spill]] %s3609_s25  ;;  %p3618_p0 = por %p195_p9, %p194_p8 }
  0x27   : > { %p3044_p2 = scmp.lt.s32.totalorder %s3449_s21, 2  ;;  %p3623_p5 = por %p391_p12, %p194_p8 }
  0x28   : > { %p3627_p7 = por %p397_p13, %p200_p10  ;;  %s549_s23 = sand.u32 1, %s3449_s21  }
  0x29   : > { %s4161_s24 = scalar_select %p3623_p5, 1, 0 }
  0x2a   : > { %s4163_s9 = scalar_select %p3627_p7, 1, 0 }
  0x2b   : > { %4162 = sst [smem:[#allocation31_spill]] %s4161_s24  ;;  %s551_s27 = sand.u32 1, %s3445_s20  }
  0x2c   : > { %4164 = sst [smem:[#allocation32_spill]] %s4163_s9  ;;  %s3633_s29 = sshll.u32 %s551_s27, 6 }
  0x2d   : > { %s2874_s30 = sshll.u32 %s3449_s21, 6  ;;  %s4165_s6 = sld [smem:[#allocation41_spill]] }
  0x2e   : > { %s553_s15 = scalar_lea.vmem [#allocation8], %s3633_s29  ;;  %p3644_p8 = pnand %p3044_p2, %p3618_p0 }
  0x2f   : > { %s561_s12 = sshll.u32 %s553_s15, 4  ;;  %s588_s9 = scalar_lea.hbm %s4113_s8, %s2874_s30  ;;  %s562_s12 = int_to_ptr.vmem [resolvable:$true] %s561_s12 }
  0x30   : > { %s589_s7 = sshll.u32 %s588_s9, 4  ;;  %s3651_s2 = scalar_lea.sflag [#allocation9], %s549_s23  ;;  %s3670_s7 = int_to_ptr.hbm [resolvable:$true] %s589_s7 }
  0x31   : > { %p3159_p10 = pneg %p3644_p8 }
  0x33   : > { %s558_s18 = scalar_lea.hbm %s4165_s6, %s2874_s30  ;;  %s3162_s20 = scalar_lea.hbm %s4165_s6, 128 }
  0x34   : > { %s559_s14 = sshll.u32 %s558_s18, 4  ;;  %s560_s14 = int_to_ptr.hbm [resolvable:$true] %s559_s14 }
  0x35   : > { %s3155_s18 = sshra.s32 %s560_s14, 4  ;;  %s3156_s18 = int_to_ptr.hbm [resolvable:$true] %s3155_s18 }
  0x36   : > { %s3157_s15 = scalar_lea.hbm %s3156_s18, 64  ;;  %p3163_p0 = scmp.lt.s32.totalorder %s3156_s18, %s4165_s6 }
  0x37   : > { %p3158_p9 = scmp.ne.s32.totalorder %s3156_s18, %s3157_s15  ;;  %p3164_p2 = scmp.lt.s32.totalorder %s3162_s20, %s3157_s15 }
  0x39   : > { %p3160_p12 = pnand %p3159_p10, %p3158_p9  ;;  %p3165_p4 = por %p3164_p2, %p3163_p0 }
  0x3b   : > { %p3161_p13 = pneg %p3160_p12 }
  0x3d   : > { %p3166_p1 = pnand %p3165_p4, %p3161_p13 }
  0x3f   : > { %3169 = shalt.err (!%p3166_p1)
}
  0x40   : > { %s4167_s9 = smov 4   ;;  %s4168_s23 = smov 64  }
  0x41   : > { %3027 = dma.hbm_to_vmem [thread:$0]  (!%p3644_p8), %s560_s14, 1024, %s562_s12, %s3651_s2, %s4168_s23, %s4168_s23, %s4167_s9  }
  0x42   : > { %s583_s30 = scalar_lea.vmem [#allocation10], %s3633_s29  ;;  %s441_s15 = sshll.u32 %s4106_s1, 4  ;;  %s442_s15 = int_to_ptr.hbm [resolvable:$true] %s441_s15 }
  0x43   : > { %s3673_s25 = sshll.u32 %s583_s30, 4  ;;  %s3455_s16 = smov [#allocation2]   ;;  %s592_s25 = int_to_ptr.vmem [resolvable:$true] %s3673_s25 }
  0x44   : > { %s443_s20 = sshll.u32 %s3455_s16, 4  ;;  %s469_s12 = sshll.u32 %s4110_s5, 4  ;;  %s444_s20 = int_to_ptr.vmem [resolvable:$true] %s443_s20  ;;  %s470_s12 = int_to_ptr.hbm [resolvable:$true] %s469_s12 }
  0x45   : > { %3008 = dma.hbm_to_vmem [thread:$0]  (!%p3582_p6), %s442_s15, 1024, %s444_s20, [#allocation3], %s4168_s23, %s4168_s23, %s4167_s9  }
  0x46   : > { %s3456_s14 = smov [#allocation7]   ;;  %s497_s18 = sshll.u32 %s4115_s10, 4  ;;  %s498_s18 = int_to_ptr.hbm [resolvable:$true] %s497_s18 }
  0x47   : > { %s471_s29 = sshll.u32 %s3456_s14, 4  ;;  %s512_s15 = sshll.u32 %s4116_s11, 4  ;;  %s472_s29 = int_to_ptr.vmem [resolvable:$true] %s471_s29  ;;  %s513_s15 = int_to_ptr.hbm [resolvable:$true] %s512_s15 }
  0x48   : > { %3014 = dma.hbm_to_vmem [thread:$0]  (!%p3582_p6), %s470_s12, 1024, %s472_s29, [#allocation6], %s4168_s23, %s4168_s23, %s4167_s9  }
  0x49   : > { %s3457_s20 = smov [#allocation13]   ;;  %s3458_s14 = smov [#allocation14]  }
  0x4a   : > { %s499_s27 = sshll.u32 %s3457_s20, 4  ;;  %s514_s30 = sshll.u32 %s3458_s14, 4  ;;  %s500_s27 = int_to_ptr.vmem [resolvable:$true] %s499_s27  ;;  %s515_s30 = int_to_ptr.vmem [resolvable:$true] %s514_s30 }
  0x4b   : > { %3020 = dma.hbm_to_vmem [thread:$0]  (!%p3582_p6), %s498_s18, 1024, %s500_s27, [#allocation12], %s4168_s23, %s4168_s23, %s4167_s9  }
  0x4c   : > { %3023 = dma.hbm_to_vmem [thread:$0]  (!%p3582_p6), %s513_s15, 128, %s515_s30, [#allocation15]  }
  0x4d   : > { %s3305_s12 = sshra.s32 %s3670_s7, 4  ;;  %s3312_s16 = scalar_lea.hbm %s4113_s8, 128  ;;  %s3306_s12 = int_to_ptr.hbm [resolvable:$true] %s3305_s12 }
  0x4e   : > { %s3307_s29 = scalar_lea.hbm %s3306_s12, 64  ;;  %p3313_p12 = scmp.lt.s32.totalorder %s3306_s12, %s4113_s8 }
  0x4f   : > { %p3308_p1 = scmp.ne.s32.totalorder %s3306_s12, %s3307_s29  ;;  %p3314_p13 = scmp.lt.s32.totalorder %s3312_s16, %s3307_s29 }
  0x51   : > { %p3310_p4 = pnand %p3308_p1, %p3159_p10  ;;  %p3315_p0 = por %p3314_p13, %p3313_p12 }
  0x53   : > { %p3311_p9 = pneg %p3310_p4 }
  0x55   : > { %p3316_p2 = pnand %p3315_p0, %p3311_p9 }
  0x57   : > { %3319 = shalt.err (!%p3316_p2)
}
  0x58   : > { %3030 = dma.hbm_to_vmem [thread:$0]  (!%p3644_p8), %s3670_s7, 1024, %s592_s25, %s3651_s2, %s4168_s23, %s4168_s23, %s4167_s9  }
  0x59   : > { %618 = sbr.rel (%p3570_p3) target bundleno = 1806 (0x70e), region = 76 }
  0x5e   : > { %p4169_p6 = scmp.eq.s32.totalorder %s3562_s22, 0 }
  0x60   : > { %3408 = dma.done.wait (%p4169_p6), [#allocation3], 1024   ;;  %p4170_p10 = pmov %p4169_p6 }
  0x61   : > { %p4171_p1 = pmov %p4169_p6 }
  0x62   : > { %3410 = vsyncadd (%p4170_p10), [#allocation3], 4294966272 }
  0x63   : > { %3412 = dma.done.wait (%p4171_p1), [#allocation6], 1152   ;;  %p4172_p4 = pmov %p4171_p1 }
  0x64   : > { %s635_s17 = sand.u32 1, %s3562_s22   ;;  %s3734_s7 = sand.u32 1, %s3441_s19  }
  0x65   : > { %3414 = vsyncadd (%p4172_p4), [#allocation6], 4294966144  ;;  %s2505_s26 = sshll.u32 %s3734_s7, 6  ;;  %s636_s24 = scalar_lea.sflag [#allocation9], %s635_s17 }
  0x66   : > { %s3737_s2 = scalar_lea.vmem [#allocation8], %s2505_s26 }
  0x67   : > { %3416 = dma.done.wait (%p3613_p11), %s636_s24, 2048  }
  0x68   : > { %3418 = vsyncadd (%p3613_p11), %s636_s24, 4294965248  ;;  %s3743_s9 = scalar_lea.vmem [#allocation10], %s2505_s26  ;;  %p4173_p3 = pmov %p4171_p1 }
  0x69   : > { %p4174_p8 = pmov %p4171_p1 }
  0x6a   : > { %3420 = dma.done.wait (%p4173_p3), [#allocation12], 2048  }
  0x6b   : > { %3422 = vsyncadd (%p4174_p8), [#allocation12], 4294965248  ;;  %p4175_p9 = pmov %p4171_p1 }
  0x6c   : > { %p4176_p12 = pmov %p4171_p1 }
  0x6d   : > { %3424 = dma.done.wait (%p4175_p9), [#allocation15], 128  }
  0x6e   : > { %3426 = vsyncadd (%p4176_p12), [#allocation15], 4294967168  ;;  %v2897_v0 = vld [vmem:[#allocation2 + $0x38] sm:$0xff]  ;;  %v2896_v1 = vld [vmem:[#allocation2 + $0x30] sm:$0xff]  ;;  %p751_p11 = scmp.lt.s32.totalorder %s3562_s22, 1  ;;  %vm1046_vm0 = vcmask 130048  }
  0x6f   : > { %911 = vmatpush.bf16.msra.mxu0 %v2897_v0  ;;  %2964 = vmatpush.bf16.msra.mxu2 %v2897_v0  ;;  %v2895_v2 = vld [vmem:[#allocation2 + $0x28] sm:$0xff]  ;;  %v2894_v3 = vld [vmem:[#allocation2 + $0x20] sm:$0xff]  ;;  %v2893_v4 = vld [vmem:[#allocation2 + $0x18] sm:$0xff]  ;;  %s4191_s25 = sld [smem:[#allocation42_spill]] }
  0x70   : > { %v2892_v5 = vld [vmem:[#allocation2 + $0x10] sm:$0xff]  ;;  %s3755_s28 = scalar_select %p751_p11, %s3562_s22, 1  ;;  %v2891_v6 = vld [vmem:[#allocation2 + $0x8] sm:$0xff]  ;;  %v2890_v7 = vld [vmem:[#allocation2] sm:$0xff] }
  0x71   : > { %v3798_v39 = vld [vmem:[#allocation5] sm:$0xff]  ;;  %s4192_s30 = sld [smem:[#allocation44_spill]] }
  0x72   : > { %s3758_s23 = sshll.u32 %s3755_s28, 6  ;;  %4179 = vst [vmem:[#allocation35_spill] sm:$0xff] %v3798_v39  ;;  %1078 = vmatpush.bf16.msra.mxu1 %v3798_v39  ;;  %2972 = vmatpush.bf16.msra.mxu3 %v3798_v39  ;;  %s2522_s16 = sshll.u32 %s3755_s28, 2 }
  0x73   : > { %912 = vmatpush.bf16.msra.mxu0 %v2896_v1  ;;  %2965 = vmatpush.bf16.msra.mxu2 %v2896_v1  ;;  %s755_s27 = scalar_lea.vmem %s4105_s0, %s3758_s23  ;;  %s3804_s12 = scalar_lea.vmem %s4108_s3, %s3758_s23 }
  0x74   : > { %v2882_v8 = vld [vmem:[%s755_s27] sm:$0xff]  ;;  %v2887_v9 = vld [vmem:[%s755_s27 + $0x28] sm:$0xff]  ;;  %v2888_v11 = vld [vmem:[%s755_s27 + $0x30] sm:$0xff]  ;;  %s3830_s6 = scalar_lea.vmem %s4109_s4, %s3758_s23  ;;  %s779_s17 = scalar_lea.vmem %s4118_s13, %s2522_s16 }
  0x75   : > { %v2883_v10 = vld [vmem:[%s755_s27 + $0x8] sm:$0xff]  ;;  %v2884_v12 = vld [vmem:[%s755_s27 + $0x10] sm:$0xff]  ;;  %v2889_v13 = vld [vmem:[%s755_s27 + $0x38] sm:$0xff]  ;;  %s3990_s15 = scalar_lea.vmem %s4191_s25, %s3758_s23  ;;  %s4194_s18 = sld [smem:[#allocation46_spill]] }
  0x76   : > { %v2885_v14 = vld [vmem:[%s755_s27 + $0x18] sm:$0xff]  ;;  %v2886_v15 = vld [vmem:[%s755_s27 + $0x20] sm:$0xff]  ;;  %v2899_v45 = vld [vmem:[%s3804_s12 + $0x8] sm:$0xff] }
  0x77   : > { %913 = vmatpush.bf16.msra.mxu0 %v2895_v2  ;;  %2966 = vmatpush.bf16.msra.mxu2 %v2895_v2  ;;  %v2898_v40 = vld [vmem:[%s3804_s12] sm:$0xff]  ;;  %v2900_v58 = vld [vmem:[%s3804_s12 + $0x10] sm:$0xff]  ;;  %v2901_v61 = vld [vmem:[%s3804_s12 + $0x18] sm:$0xff] }
  0x78   : > { %2623 = vmatmul.msk.bf16.vlgmr.msra.gmra.mxu1 %vm1046_vm0, %v2898_v40  ;;  %v3834_v60 = vld [vmem:[%s3830_s6] sm:$0xff]  ;;  %v3840_v62 = vld [vmem:[%s3830_s6 + $0x8] sm:$0xff]  ;;  %v3846_v0 = vld [vmem:[%s3830_s6 + $0x10] sm:$0xff] }
  0x79   : > { %v2902_v63 = vld [vmem:[%s3804_s12 + $0x20] sm:$0xff]  ;;  %v2903_v1 = vld [vmem:[%s3804_s12 + $0x28] sm:$0xff]  ;;  %v3852_v2 = vld [vmem:[%s3830_s6 + $0x18] sm:$0xff] }
  0x7b   : > { %914 = vmatpush.bf16.msra.mxu0 %v2894_v3  ;;  %2967 = vmatpush.bf16.msra.mxu2 %v2894_v3  ;;  %v2904_v3 = vld [vmem:[%s3804_s12 + $0x30] sm:$0xff] }
  0x7c   : > { %2629 = vmatmul.msk.bf16.vlgmr.msra.gmra.mxu3 %vm1046_vm0, %v2904_v3 }
  0x7f   : > { %915 = vmatpush.bf16.msra.mxu0 %v2893_v4  ;;  %2968 = vmatpush.bf16.msra.mxu2 %v2893_v4  ;;  %v3859_v4 = vld [vmem:[%s3830_s6 + $0x20] sm:$0xff] }
  0x83   : > { %916 = vmatpush.bf16.msra.mxu0 %v2892_v5  ;;  %2969 = vmatpush.bf16.msra.mxu2 %v2892_v5  ;;  %v2905_v5 = vld [vmem:[%s3804_s12 + $0x38] sm:$0xff] }
  0x87   : > { %917 = vmatpush.bf16.msra.mxu0 %v2891_v6  ;;  %2970 = vmatpush.bf16.msra.mxu2 %v2891_v6  ;;  %v3865_v6 = vld [vmem:[%s3830_s6 + $0x28] sm:$0xff] }
  0x88   : > { %2624 = vmatmul.msk.bf16.gmra.mxu1 %vm1046_vm0, %v2899_v45 }
  0x8b   : > { %918 = vmatpush.bf16.msra.mxu0 %v2890_v7  ;;  %2971 = vmatpush.bf16.msra.mxu2 %v2890_v7  ;;  %v2921_v7 = vld [vmem:[#allocation7 + $0x38] sm:$0xff] }
  0x8c   : > { %2630 = vmatmul.msk.bf16.gmra.mxu3 %vm1046_vm0, %v2905_v5 }
  0x8d   : > { %1321 = vmatpush.bf16.msrb.mxu3 %v2921_v7 }
  0x8e   : > { %919 = vmatmul.bf16.vlgmr.msra.gmra.mxu0 %v2882_v8  ;;  %944 = vmatmul.bf16.vlgmr.msra.gmra.mxu2 %v2887_v9  ;;  %v2920_v8 = vld [vmem:[#allocation7 + $0x30] sm:$0xff]  ;;  %v2919_v9 = vld [vmem:[#allocation7 + $0x28] sm:$0xff] }
  0x8f   : > { %1483 = vmatpush.bf16.msrb.mxu0 %v2921_v7 }
  0x91   : > { %1322 = vmatpush.bf16.msrb.mxu3 %v2920_v8 }
  0x93   : > { %1484 = vmatpush.bf16.msrb.mxu0 %v2920_v8 }
  0x95   : > { %1323 = vmatpush.bf16.msrb.mxu3 %v2919_v9 }
  0x97   : > { %1485 = vmatpush.bf16.msrb.mxu0 %v2919_v9 }
  0x98   : > { %2625 = vmatmul.msk.bf16.gmra.mxu1 %vm1046_vm0, %v2900_v58 }
  0x9e   : > { %924 = vmatmul.bf16.gmra.mxu0 %v2883_v10  ;;  %949 = vmatmul.bf16.gmra.mxu2 %v2888_v11  ;;  %v2918_v10 = vld [vmem:[#allocation7 + $0x20] sm:$0xff]  ;;  %v3869_v11 = vld [vmem:[%s3830_s6 + $0x30] sm:$0xff] }
  0x9f   : > { %1324 = vmatpush.bf16.msrb.mxu3 %v2918_v10  ;;  %1486 = vmatpush.bf16.msrb.mxu0 %v2918_v10 }
  0xa8   : > { %2626 = vmatmul.msk.bf16.gmra.mxu1 %vm1046_vm0, %v2901_v61 }
  0xae   : > { %929 = vmatmul.bf16.gmra.mxu0 %v2884_v12  ;;  %954 = vmatmul.bf16.gmra.mxu2 %v2889_v13  ;;  %v2917_v12 = vld [vmem:[#allocation7 + $0x18] sm:$0xff]  ;;  %v2916_v13 = vld [vmem:[#allocation7 + $0x10] sm:$0xff] }
  0xaf   : > { %1325 = vmatpush.bf16.msrb.mxu3 %v2917_v12  ;;  %1487 = vmatpush.bf16.msrb.mxu0 %v2917_v12 }
  0xb3   : > { %1326 = vmatpush.bf16.msrb.mxu3 %v2916_v13  ;;  %1488 = vmatpush.bf16.msrb.mxu0 %v2916_v13 }
  0xb8   : > { %2627 = vmatmul.msk.bf16.gmra.mxu1 %vm1046_vm0, %v2902_v63 }
  0xbe   : > { %934 = vmatmul.bf16.gmra.mxu0 %v2885_v14  ;;  %v2915_v14 = vld [vmem:[#allocation7 + $0x8] sm:$0xff] }
  0xbf   : > { %1327 = vmatpush.bf16.msrb.mxu3 %v2915_v14  ;;  %1489 = vmatpush.bf16.msrb.mxu0 %v2915_v14 }
  0xc8   : > { %2628 = vmatmul.msk.bf16.gmra.mxu1 %vm1046_vm0, %v2903_v1 }
  0xce   : > { %939 = vmatmul.bf16.gmra.mxu0 %v2886_v15  ;;  %v2914_v15 = vld [vmem:[#allocation7] sm:$0xff] }
  0xcf   : > { %1328 = vmatpush.bf16.msrb.mxu3 %v2914_v15  ;;  %1490 = vmatpush.bf16.msrb.mxu0 %v2914_v15 }
 0x10b   : > { %v3764_v16 = vpop.f32.mrf.mxu0 }
 0x10c   : > { %v960_v57 = vmax.f32 %v3764_v16, 0.0 }
 0x111   : > { %v3766_v17 = vpop.f32.mrf.mxu2 }
 0x112   : > { %v970_v35 = vmax.f32 %v3766_v17, 0.0 }
 0x113   : > { %v3768_v18 = vpop.f32.mrf.mxu0 }
 0x114   : > { %v961_v56 = vmax.f32 %v3768_v18, 0.0 }
 0x116   : > { %v976_v59 = vpack.c.bf16 %v961_v56, %v960_v57 }
 0x119   : > { %v3770_v19 = vpop.f32.mrf.mxu2 }
 0x11a   : > { %v971_v36 = vmax.f32 %v3770_v19, 0.0 }
 0x11b   : > { %v3772_v20 = vpop.f32.mrf.mxu0 }
 0x11c   : > { %v981_v38 = vpack.c.bf16 %v971_v36, %v970_v35  ;;  %v962_v54 = vmax.f32 %v3772_v20, 0.0 }
 0x121   : > { %v3774_v21 = vpop.f32.mrf.mxu2 }
 0x122   : > { %v972_v32 = vmax.f32 %v3774_v21, 0.0 }
 0x123   : > { %v3776_v22 = vpop.f32.mrf.mxu0 }
 0x124   : > { %v963_v53 = vmax.f32 %v3776_v22, 0.0 }
 0x126   : > { %v977_v55 = vpack.c.bf16 %v963_v53, %v962_v54 }
 0x129   : > { %v3778_v23 = vpop.f32.mrf.mxu2 }
 0x12a   : > { %4177 = vst [vmem:[#allocation33_spill] sm:$0xff] %v3778_v23  ;;  %v973_v33 = vmax.f32 %v3778_v23, 0.0 }
 0x12b   : > { %v3780_v24 = vpop.f32.mrf.mxu0 }
 0x12c   : > { %v982_v34 = vpack.c.bf16 %v973_v33, %v972_v32  ;;  %v964_v51 = vmax.f32 %v3780_v24, 0.0 }
 0x131   : > { %v3782_v25 = vpop.f32.mrf.mxu2 }
 0x132   : > { %4178 = vst [vmem:[#allocation34_spill] sm:$0xff] %v3782_v25  ;;  %v974_v27 = vmax.f32 %v3782_v25, 0.0 }
 0x133   : > { %v3784_v26 = vpop.f32.mrf.mxu0 }
 0x134   : > { %v965_v50 = vmax.f32 %v3784_v26, 0.0 }
 0x136   : > { %v978_v52 = vpack.c.bf16 %v965_v50, %v964_v51 }
 0x139   : > { %v3787_v28 = vpop.f32.mrf.mxu2 }
 0x13a   : > { %v975_v29 = vmax.f32 %v3787_v28, 0.0 }
 0x13b   : > { %v3790_v30 = vpop.f32.mrf.mxu0 }
 0x13c   : > { %v983_v31 = vpack.c.bf16 %v975_v29, %v974_v27  ;;  %v966_v48 = vmax.f32 %v3790_v30, 0.0  ;;  %v3873_v27 = vld [vmem:[%s3830_s6 + $0x38] sm:$0xff]  ;;  %v3875_v29 = vpop.f32.mrf.mxu1  ;;  %s2871_s6 = sshll.u32 %s3562_s22, 3 }
 0x13d   : > { %s2226_s26 = scalar_lea.hbm %s4194_s18, %s2871_s6 }
 0x13e   : > { %1200 = vmatpush.bf16.msrb.mxu2 %v983_v31  ;;  %s2230_s24 = sshll.u32 %s2226_s26, 4  ;;  %s2231_s24 = int_to_ptr.hbm [resolvable:$true] %s2230_s24 }
 0x13f   : > { %s3349_s25 = sshra.s32 %s2231_s24, 4  ;;  %s3350_s25 = int_to_ptr.hbm [resolvable:$true] %s3349_s25 }
 0x142   : > { %1201 = vmatpush.bf16.msrb.mxu2 %v982_v34 }
 0x143   : > { %v3796_v37 = vpop.f32.mrf.mxu0 }
 0x144   : > { %v967_v47 = vmax.f32 %v3796_v37, 0.0  ;;  %v3878_v31 = vpop.f32.mrf.mxu1 }
 0x146   : > { %1202 = vmatpush.bf16.msrb.mxu2 %v981_v38  ;;  %v979_v49 = vpack.c.bf16 %v967_v47, %v966_v48 }
 0x14b   : > { %v3810_v41 = vpop.f32.mrf.mxu0 }
 0x14c   : > { %v968_v43 = vmax.f32 %v3810_v41, 0.0  ;;  %v3880_v32 = vpop.f32.mrf.mxu1 }
 0x153   : > { %v3812_v42 = vpop.f32.mrf.mxu0 }
 0x154   : > { %v969_v44 = vmax.f32 %v3812_v42, 0.0  ;;  %v3882_v35 = vpop.f32.mrf.mxu1 }
 0x156   : > { %v980_v46 = vpack.c.bf16 %v969_v44, %v968_v43 }
 0x158   : > { %1203 = vmatpush.bf16.msrb.mxu2 %v980_v46 }
 0x15c   : > { %1204 = vmatpush.bf16.msrb.mxu2 %v979_v49  ;;  %v3886_v44 = vpop.f32.mrf.mxu1 }
 0x160   : > { %1205 = vmatpush.bf16.msrb.mxu2 %v978_v52 }
 0x164   : > { %1206 = vmatpush.bf16.msrb.mxu2 %v977_v55  ;;  %v3890_v49 = vpop.f32.mrf.mxu1 }
 0x168   : > { %1207 = vmatpush.bf16.msrb.mxu2 %v976_v59 }
 0x16b   : > { %1208 = vmatmul.bf16.vlgmr.msrb.gmra.mxu2 %v3834_v60 }
 0x16c   : > { %v3892_v51 = vpop.f32.mrf.mxu1 }
 0x174   : > { %v3896_v56 = vpop.f32.mrf.mxu1 }
 0x17b   : > { %1213 = vmatmul.bf16.gmra.mxu2 %v3840_v62 }
 0x17c   : > { %v3900_v63 = vpop.f32.mrf.mxu1 }
 0x184   : > { %v3902_v5 = vpop.f32.mrf.mxu1 }
 0x18b   : > { %1218 = vmatmul.bf16.gmra.mxu2 %v3846_v0 }
 0x18c   : > { %v3906_v12 = vpop.f32.mrf.mxu1 }
 0x194   : > { %v3908_v14 = vpop.f32.mrf.mxu1 }
 0x19b   : > { %1223 = vmatmul.bf16.gmra.mxu2 %v3852_v2 }
 0x1ab   : > { %1228 = vmatmul.bf16.gmra.mxu2 %v3859_v4 }
 0x1bb   : > { %1233 = vmatmul.bf16.gmra.mxu2 %v3865_v6 }
 0x1cb   : > { %1238 = vmatmul.bf16.gmra.mxu2 %v3869_v11 }
 0x1db   : > { %1243 = vmatmul.bf16.gmra.mxu2 %v3873_v27 }
 0x1ee   : > { %v1209_v33 = vpop.f32.mrf.mxu2 }
 0x1ef   : > { %v1249_v36 = vadd.f32 %v1209_v33, %v3875_v29 }
 0x1f6   : > { %v1211_v34 = vpop.f32.mrf.mxu2 }
 0x1f7   : > { %v1250_v38 = vadd.f32 %v1211_v34, %v3878_v31 }
 0x1f9   : > { %v1265_v40 = vpack.c.bf16 %v1250_v38, %v1249_v36  ;;  %v3912_v36 = vpop.f32.mrf.mxu3 }
 0x1fa   : > { %4180 = vst [vmem:[#allocation36_spill] sm:$0xff] %v3912_v36 }
 0x1fb   : > { %1329 = vmatmul.bf16.vlgmr.msrb.gmra.mxu3 %v1265_v40 }
 0x1fe   : > { %v1214_v43 = vpop.f32.mrf.mxu2 }
 0x1ff   : > { %v1251_v46 = vadd.f32 %v1214_v43, %v3880_v32 }
 0x201   : > { %v3914_v43 = vpop.f32.mrf.mxu3 }
 0x202   : > { %4181 = vst [vmem:[#allocation37_spill] sm:$0xff] %v3914_v43 }
 0x206   : > { %v1216_v45 = vpop.f32.mrf.mxu2 }
 0x207   : > { %v1252_v47 = vadd.f32 %v1216_v45, %v3882_v35 }
 0x209   : > { %v1266_v48 = vpack.c.bf16 %v1252_v47, %v1251_v46 }
 0x20b   : > { %1334 = vmatmul.bf16.gmra.mxu3 %v1266_v48 }
 0x20e   : > { %v1219_v50 = vpop.f32.mrf.mxu2 }
 0x20f   : > { %v1253_v53 = vadd.f32 %v1219_v50, %v3886_v44  ;;  %v3918_v50 = vpop.f32.mrf.mxu3 }
 0x210   : > { %4182 = vst [vmem:[#allocation38_spill] sm:$0xff] %v3918_v50 }
 0x216   : > { %v1221_v52 = vpop.f32.mrf.mxu2 }
 0x217   : > { %v1254_v54 = vadd.f32 %v1221_v52, %v3890_v49 }
 0x219   : > { %v1267_v55 = vpack.c.bf16 %v1254_v54, %v1253_v53  ;;  %v3920_v53 = vpop.f32.mrf.mxu3 }
 0x21a   : > { %4183 = vst [vmem:[#allocation39_spill] sm:$0xff] %v3920_v53 }
 0x21b   : > { %1339 = vmatmul.bf16.gmra.mxu3 %v1267_v55 }
 0x21e   : > { %v1224_v57 = vpop.f32.mrf.mxu2 }
 0x21f   : > { %v1255_v59 = vadd.f32 %v1224_v57, %v3892_v51 }
 0x226   : > { %v1226_v58 = vpop.f32.mrf.mxu2 }
 0x227   : > { %v1256_v61 = vadd.f32 %v1226_v58, %v3896_v56 }
 0x229   : > { %v1268_v1 = vpack.c.bf16 %v1256_v61, %v1255_v59 }
 0x22b   : > { %1344 = vmatmul.bf16.gmra.mxu3 %v1268_v1 }
 0x22e   : > { %v1229_v3 = vpop.f32.mrf.mxu2 }
 0x22f   : > { %v1257_v8 = vadd.f32 %v1229_v3, %v3900_v63 }
 0x236   : > { %v1231_v7 = vpop.f32.mrf.mxu2 }
 0x237   : > { %v1258_v9 = vadd.f32 %v1231_v7, %v3902_v5 }
 0x239   : > { %v1269_v10 = vpack.c.bf16 %v1258_v9, %v1257_v8 }
 0x23b   : > { %1349 = vmatmul.bf16.gmra.mxu3 %v1269_v10 }
 0x23e   : > { %v1234_v13 = vpop.f32.mrf.mxu2 }
 0x23f   : > { %v1259_v33 = vadd.f32 %v1234_v13, %v3906_v12 }
 0x246   : > { %v1236_v15 = vpop.f32.mrf.mxu2 }
 0x247   : > { %v1260_v34 = vadd.f32 %v1236_v15, %v3908_v14 }
 0x249   : > { %v1270_v38 = vpack.c.bf16 %v1260_v34, %v1259_v33 }
 0x24b   : > { %1354 = vmatmul.bf16.gmra.mxu3 %v1270_v38 }
 0x24e   : > { %v1239_v40 = vpop.f32.mrf.mxu2 }
 0x24f   : > { %v1261_v46 = vadd.f32 %v1239_v40, %v3912_v36 }
 0x256   : > { %v1241_v45 = vpop.f32.mrf.mxu2 }
 0x257   : > { %v1262_v47 = vadd.f32 %v1241_v45, %v3914_v43 }
 0x259   : > { %v1271_v48 = vpack.c.bf16 %v1262_v47, %v1261_v46 }
 0x25b   : > { %1359 = vmatmul.bf16.gmra.mxu3 %v1271_v48 }
 0x25e   : > { %v1244_v52 = vpop.f32.mrf.mxu2 }
 0x25f   : > { %v1263_v55 = vadd.f32 %v1244_v52, %v3918_v50 }
 0x266   : > { %v1246_v54 = vpop.f32.mrf.mxu2 }
 0x267   : > { %v1264_v57 = vadd.f32 %v1246_v54, %v3920_v53 }
 0x269   : > { %v1272_v58 = vpack.c.bf16 %v1264_v57, %v1263_v55 }
 0x26b   : > { %1364 = vmatmul.bf16.gmra.mxu3 %v1272_v58 }
 0x27e   : > { %v1330_v59 = vpop.f32.mrf.mxu3 }
 0x286   : > { %v1332_v61 = vpop.f32.mrf.mxu3 }
 0x28e   : > { %v1335_v1 = vpop.f32.mrf.mxu3 }
 0x296   : > { %v1337_v3 = vpop.f32.mrf.mxu3 }
 0x29e   : > { %v1340_v7 = vpop.f32.mrf.mxu3 }
 0x2a6   : > { %v1342_v8 = vpop.f32.mrf.mxu3 }
 0x2ae   : > { %v1345_v9 = vpop.f32.mrf.mxu3 }
 0x2b6   : > { %v1347_v10 = vpop.f32.mrf.mxu3 }
 0x2be   : > { %v1350_v13 = vpop.f32.mrf.mxu3 }
 0x2c6   : > { %v1352_v15 = vpop.f32.mrf.mxu3 }
 0x2c7   : > { %v1379_v36 = vadd.f32 %v1352_v15, %v3812_v42  ;;  %v1374_v15 = vadd.f32 %v1340_v7, %v3780_v24 }
 0x2ce   : > { %v1355_v33 = vpop.f32.mrf.mxu3 }
 0x2cf   : > { %v1380_v50 = vadd.f32 %v1355_v33, %v3766_v17  ;;  %v1375_v33 = vadd.f32 %v1342_v8, %v3784_v26  ;;  %v1370_v8 = vadd.f32 %v1330_v59, %v3764_v16 }
 0x2d6   : > { %v1357_v34 = vpop.f32.mrf.mxu3 }
 0x2d7   : > { %v1381_v58 = vadd.f32 %v1357_v34, %v3770_v19  ;;  %v1376_v34 = vadd.f32 %v1345_v9, %v3790_v30 }
 0x2de   : > { %v1360_v38 = vpop.f32.mrf.mxu3 }
 0x2df   : > { %v1382_v54 = vadd.f32 %v1360_v38, %v3774_v21  ;;  %v1377_v38 = vadd.f32 %v1347_v10, %v3796_v37 }
 0x2e1   : > { %v1398_v43 = vmax.f32 %v1382_v54, 0.0  ;;  %v1392_v54 = vmax.f32 %v1376_v34, 0.0 }
 0x2e6   : > { %v1362_v40 = vpop.f32.mrf.mxu3 }
 0x2e7   : > { %v1383_v48 = vadd.f32 %v1362_v40, %v3778_v23  ;;  %v1378_v40 = vadd.f32 %v1350_v13, %v3810_v41  ;;  %v1396_v23 = vmax.f32 %v1380_v50, 0.0  ;;  %v1372_v50 = vadd.f32 %v1335_v1, %v3772_v20 }
 0x2e9   : > { %v1399_v39 = vmax.f32 %v1383_v48, 0.0  ;;  %v1394_v48 = vmax.f32 %v1378_v40, 0.0  ;;  %v1388_v13 = vmax.f32 %v1372_v50, 0.0 }
 0x2ee   : > { %v1365_v45 = vpop.f32.mrf.mxu3 }
 0x2ef   : > { %v1384_v46 = vadd.f32 %v1365_v45, %v3782_v25  ;;  %v1397_v45 = vmax.f32 %v1381_v58, 0.0  ;;  %v1408_v25 = vpack.c.bf16 %v1399_v39, %v1398_v43  ;;  %v1373_v39 = vadd.f32 %v1337_v3, %v3776_v22 }
 0x2f0   : > { %v1391_v43 = vmax.f32 %v1375_v33, 0.0 }
 0x2f1   : > { %v1400_v55 = vmax.f32 %v1384_v46, 0.0  ;;  %v1395_v46 = vmax.f32 %v1379_v36, 0.0  ;;  %v1390_v36 = vmax.f32 %v1374_v15, 0.0  ;;  %v1389_v9 = vmax.f32 %v1373_v39, 0.0  ;;  %v4184_v39 = vld [vmem:[#allocation36_spill] sm:$0xff] }
 0x2f3   : > { %v1404_v10 = vpack.c.bf16 %v1391_v43, %v1390_v36  ;;  %v1403_v7 = vpack.c.bf16 %v1389_v9, %v1388_v13 }
 0x2f6   : > { %v1367_v47 = vpop.f32.mrf.mxu3 }
 0x2f7   : > { %v1385_v52 = vadd.f32 %v1367_v47, %v3787_v28  ;;  %v1407_v47 = vpack.c.bf16 %v1397_v45, %v1396_v23  ;;  %v1371_v23 = vadd.f32 %v1332_v61, %v3768_v18 }
 0x2f9   : > { %v1401_v57 = vmax.f32 %v1385_v52, 0.0  ;;  %v1393_v52 = vmax.f32 %v1377_v38, 0.0 }
 0x2fb   : > { %v1409_v53 = vpack.c.bf16 %v1401_v57, %v1400_v55  ;;  %v1387_v55 = vmax.f32 %v1371_v23, 0.0  ;;  %v1386_v57 = vmax.f32 %v1370_v8, 0.0  ;;  %v4186_v23 = vld [vmem:[#allocation38_spill] sm:$0xff] }
 0x2fd   : > { %1410 = vmatpush.bf16.msrb.mxu1 %v1409_v53  ;;  %v1406_v53 = vpack.c.bf16 %v1395_v46, %v1394_v48  ;;  %v1402_v58 = vpack.c.bf16 %v1387_v55, %v1386_v57 }
 0x301   : > { %1411 = vmatpush.bf16.msrb.mxu1 %v1408_v25  ;;  %v1405_v25 = vpack.c.bf16 %v1393_v52, %v1392_v54 }
 0x305   : > { %1412 = vmatpush.bf16.msrb.mxu1 %v1407_v47 }
 0x309   : > { %1413 = vmatpush.bf16.msrb.mxu1 %v1406_v53 }
 0x30d   : > { %1414 = vmatpush.bf16.msrb.mxu1 %v1405_v25  ;;  %v4185_v25 = vld [vmem:[#allocation37_spill] sm:$0xff] }
 0x311   : > { %1415 = vmatpush.bf16.msrb.mxu1 %v1404_v10  ;;  %v4187_v10 = vld [vmem:[#allocation39_spill] sm:$0xff] }
 0x315   : > { %1416 = vmatpush.bf16.msrb.mxu1 %v1403_v7 }
 0x319   : > { %1417 = vmatpush.bf16.msrb.mxu1 %v1402_v58 }
 0x31c   : > { %1418 = vmatmul.bf16.vlgmr.msrb.gmra.mxu1 %v3834_v60 }
 0x32c   : > { %1423 = vmatmul.bf16.gmra.mxu1 %v3840_v62 }
 0x33c   : > { %1428 = vmatmul.bf16.gmra.mxu1 %v3846_v0 }
 0x34c   : > { %1433 = vmatmul.bf16.gmra.mxu1 %v3852_v2 }
 0x35c   : > { %1438 = vmatmul.bf16.gmra.mxu1 %v3859_v4 }
 0x36c   : > { %1443 = vmatmul.bf16.gmra.mxu1 %v3865_v6 }
 0x37c   : > { %1448 = vmatmul.bf16.gmra.mxu1 %v3869_v11 }
 0x38c   : > { %1453 = vmatmul.bf16.gmra.mxu1 %v3873_v27 }
 0x399   : > { %v1419_v59 = vpop.f32.mrf.mxu1 }
 0x39a   : > { %v1459_v1 = vadd.f32 %v1419_v59, %v3875_v29 }
 0x3a1   : > { %v1421_v61 = vpop.f32.mrf.mxu1 }
 0x3a2   : > { %v1460_v60 = vadd.f32 %v1421_v61, %v3878_v31 }
 0x3a4   : > { %v1475_v3 = vpack.c.bf16 %v1460_v60, %v1459_v1 }
 0x3a6   : > { %1491 = vmatmul.bf16.vlgmr.msrb.gmra.mxu0 %v1475_v3 }
 0x3a9   : > { %v1424_v62 = vpop.f32.mrf.mxu1 }
 0x3aa   : > { %v1461_v2 = vadd.f32 %v1424_v62, %v3880_v32 }
 0x3b1   : > { %v1426_v0 = vpop.f32.mrf.mxu1 }
 0x3b2   : > { %v1462_v4 = vadd.f32 %v1426_v0, %v3882_v35 }
 0x3b4   : > { %v1476_v45 = vpack.c.bf16 %v1462_v4, %v1461_v2 }
 0x3b6   : > { %1496 = vmatmul.bf16.gmra.mxu0 %v1476_v45  ;;  %v4188_v45 = vld [vmem:[#allocation34_spill] sm:$0xff] }
 0x3b9   : > { %v1429_v6 = vpop.f32.mrf.mxu1 }
 0x3ba   : > { %v1463_v27 = vadd.f32 %v1429_v6, %v3886_v44 }
 0x3c1   : > { %v1431_v11 = vpop.f32.mrf.mxu1 }
 0x3c2   : > { %v1464_v40 = vadd.f32 %v1431_v11, %v3890_v49 }
 0x3c4   : > { %v1477_v38 = vpack.c.bf16 %v1464_v40, %v1463_v27  ;;  %v4189_v27 = vld [vmem:[#allocation33_spill] sm:$0xff] }
 0x3c6   : > { %1501 = vmatmul.bf16.gmra.mxu0 %v1477_v38 }
 0x3c9   : > { %v1434_v29 = vpop.f32.mrf.mxu1 }
 0x3ca   : > { %v1465_v46 = vadd.f32 %v1434_v29, %v3892_v51 }
 0x3d1   : > { %v1436_v31 = vpop.f32.mrf.mxu1 }
 0x3d2   : > { %v1466_v47 = vadd.f32 %v1436_v31, %v3896_v56 }
 0x3d4   : > { %v1478_v34 = vpack.c.bf16 %v1466_v47, %v1465_v46 }
 0x3d6   : > { %1506 = vmatmul.bf16.gmra.mxu0 %v1478_v34 }
 0x3d9   : > { %v1439_v32 = vpop.f32.mrf.mxu1 }
 0x3da   : > { %v1467_v48 = vadd.f32 %v1439_v32, %v3900_v63 }
 0x3e1   : > { %v1441_v35 = vpop.f32.mrf.mxu1 }
 0x3e2   : > { %v1468_v33 = vadd.f32 %v1441_v35, %v3902_v5 }
 0x3e4   : > { %v1479_v52 = vpack.c.bf16 %v1468_v33, %v1467_v48 }
 0x3e6   : > { %1511 = vmatmul.bf16.gmra.mxu0 %v1479_v52 }
 0x3e9   : > { %v1444_v44 = vpop.f32.mrf.mxu1 }
 0x3ea   : > { %v1469_v53 = vadd.f32 %v1444_v44, %v3906_v12 }
 0x3f1   : > { %v1446_v49 = vpop.f32.mrf.mxu1 }
 0x3f2   : > { %v1470_v15 = vadd.f32 %v1446_v49, %v3908_v14 }
 0x3f4   : > { %v1480_v54 = vpack.c.bf16 %v1470_v15, %v1469_v53 }
 0x3f6   : > { %1516 = vmatmul.bf16.gmra.mxu0 %v1480_v54 }
 0x3f9   : > { %v1449_v51 = vpop.f32.mrf.mxu1 }
 0x3fa   : > { %v1471_v43 = vadd.f32 %v1449_v51, %v4184_v39 }
 0x401   : > { %v1451_v56 = vpop.f32.mrf.mxu1 }
 0x402   : > { %v1472_v50 = vadd.f32 %v1451_v56, %v4185_v25 }
 0x404   : > { %v1481_v36 = vpack.c.bf16 %v1472_v50, %v1471_v43 }
 0x406   : > { %1521 = vmatmul.bf16.gmra.mxu0 %v1481_v36 }
 0x409   : > { %v1454_v63 = vpop.f32.mrf.mxu1 }
 0x40a   : > { %v1473_v9 = vadd.f32 %v1454_v63, %v4186_v23 }
 0x411   : > { %v1456_v5 = vpop.f32.mrf.mxu1 }
 0x412   : > { %v1474_v8 = vadd.f32 %v1456_v5, %v4187_v10  ;;  %v2922_v10 = vld [vmem:[%s3990_s15] sm:$0xff] }
 0x414   : > { %v1482_v13 = vpack.c.bf16 %v1474_v8, %v1473_v9  ;;  %v4190_v9 = vld [vmem:[#allocation35_spill] sm:$0xff] }
 0x415   : > { %v2931_v8 = vld [vmem:[%s3743_s9 + $0x8] sm:$0xff] }
 0x416   : > { %1526 = vmatmul.bf16.gmra.mxu0 %v1482_v13  ;;  %v2923_v13 = vld [vmem:[%s3990_s15 + $0x8] sm:$0xff] }
 0x423   : > { %v1492_v12 = vpop.f32.mrf.mxu0 }
 0x42b   : > { %v1494_v14 = vpop.f32.mrf.mxu0 }
 0x433   : > { %v1497_v55 = vpop.f32.mrf.mxu0 }
 0x434   : > { %v1534_v25 = vadd.f32 %v1497_v55, %v3772_v20  ;;  %v2930_v20 = vld [vmem:[%s3743_s9] sm:$0xff]  ;;  %v2933_v55 = vld [vmem:[%s3743_s9 + $0x18] sm:$0xff] }
 0x436   : > { %v1550_v63 = vmax.f32 %v1534_v25, 0.0 }
 0x43b   : > { %v1499_v7 = vpop.f32.mrf.mxu0 }
 0x443   : > { %v1502_v57 = vpop.f32.mrf.mxu0 }
 0x444   : > { %v1536_v56 = vadd.f32 %v1502_v57, %v3780_v24  ;;  %v1532_v24 = vadd.f32 %v1492_v12, %v3764_v16  ;;  %v1572_v16 = vld [vmem:[%s779_s17] sm:$0xf]  ;;  %v2932_v12 = vld [vmem:[%s3743_s9 + $0x10] sm:$0xff]  ;;  %v2934_v57 = vld [vmem:[%s3743_s9 + $0x20] sm:$0xff]  ;;  %s4195_s17 = smov %s4194_s18 }
 0x445   : > { %p3356_p6 = scmp.lt.s32.totalorder %s3350_s25, %s4195_s17 }
 0x446   : > { %v1548_v23 = vmax.f32 %v1532_v24, 0.0  ;;  %v2942_v24 = vld [vmem:[%s3737_s2 + $0x20] sm:$0xff] }
 0x44b   : > { %v1504_v58 = vpop.f32.mrf.mxu0 }
 0x453   : > { %v1507_v59 = vpop.f32.mrf.mxu0 }
 0x454   : > { %v1538_v15 = vadd.f32 %v1507_v59, %v3790_v30  ;;  %v1552_v30 = vmax.f32 %v1536_v56, 0.0  ;;  %v2935_v59 = vld [vmem:[%s3743_s9 + $0x28] sm:$0xff] }
 0x456   : > { %v1554_v39 = vmax.f32 %v1538_v15, 0.0 }
 0x45b   : > { %v1509_v61 = vpop.f32.mrf.mxu0 }
 0x463   : > { %v1512_v1 = vpop.f32.mrf.mxu0 }
 0x464   : > { %v1540_v49 = vadd.f32 %v1512_v1, %v3810_v41  ;;  %v1535_v41 = vadd.f32 %v1499_v7, %v3776_v22  ;;  %v2925_v7 = vld [vmem:[%s3990_s15 + $0x18] sm:$0xff] }
 0x465   : > { %v2952_v1 = vld [vmem:[#allocation11 + $0x30] sm:$0xff] }
 0x466   : > { %v1556_v54 = vmax.f32 %v1540_v49, 0.0  ;;  %v1551_v50 = vmax.f32 %v1535_v41, 0.0  ;;  %v2941_v41 = vld [vmem:[%s3737_s2 + $0x18] sm:$0xff] }
 0x468   : > { %v1565_v5 = vpack.c.bf16 %v1551_v50, %v1550_v63 }
 0x46b   : > { %v1514_v60 = vpop.f32.mrf.mxu0 }
 0x46c   : > { %v1541_v33 = vadd.f32 %v1514_v60, %v3812_v42  ;;  %v2927_v60 = vld [vmem:[%s3990_s15 + $0x28] sm:$0xff] }
 0x46e   : > { %v1557_v53 = vmax.f32 %v1541_v33, 0.0 }
 0x470   : > { %v1568_v42 = vpack.c.bf16 %v1557_v53, %v1556_v54 }
 0x473   : > { %v1517_v3 = vpop.f32.mrf.mxu0 }
 0x474   : > { %v1542_v35 = vadd.f32 %v1517_v3, %v3766_v17  ;;  %v1537_v17 = vadd.f32 %v1504_v58, %v3784_v26  ;;  %v1533_v26 = vadd.f32 %v1494_v14, %v3768_v18  ;;  %v2924_v14 = vld [vmem:[%s3990_s15 + $0x10] sm:$0xff]  ;;  %v2926_v58 = vld [vmem:[%s3990_s15 + $0x20] sm:$0xff]  ;;  %v2936_v3 = vld [vmem:[%s3743_s9 + $0x30] sm:$0xff] }
 0x476   : > { %v1549_v22 = vmax.f32 %v1533_v26, 0.0 }
 0x478   : > { %v1564_v18 = vpack.c.bf16 %v1549_v22, %v1548_v23 }
 0x47b   : > { %v1519_v62 = vpop.f32.mrf.mxu0 }
 0x47c   : > { %v1543_v47 = vadd.f32 %v1519_v62, %v3770_v19  ;;  %v2961_v62 = vld [vmem:[#allocation13 + $0x38] sm:$0xff] }
 0x47d   : > { %1933 = vmatpush.bf16.msra.mxu1 %v2961_v62  ;;  %v2945_v62 = vld [vmem:[%s3737_s2 + $0x38] sm:$0xff] }
 0x47e   : > { %v1559_v52 = vmax.f32 %v1543_v47, 0.0  ;;  %v2946_v47 = vld [vmem:[#allocation11] sm:$0xff] }
 0x483   : > { %v1522_v0 = vpop.f32.mrf.mxu0 }
 0x484   : > { %v1544_v29 = vadd.f32 %v1522_v0, %v3774_v21  ;;  %v1539_v21 = vadd.f32 %v1509_v61, %v3796_v37  ;;  %v1553_v37 = vmax.f32 %v1537_v17, 0.0  ;;  %v2953_v61 = vld [vmem:[#allocation11 + $0x38] sm:$0xff]  ;;  %v2951_v0 = vld [vmem:[#allocation11 + $0x28] sm:$0xff] }
 0x485   : > { %2078 = vmatpush.bf16.msra.mxu0 %v2953_v61 }
 0x486   : > { %v1560_v48 = vmax.f32 %v1544_v29, 0.0  ;;  %v1555_v51 = vmax.f32 %v1539_v21, 0.0  ;;  %v1566_v36 = vpack.c.bf16 %v1553_v37, %v1552_v30  ;;  %v2957_v29 = vld [vmem:[#allocation13 + $0x18] sm:$0xff] }
 0x488   : > { %v1567_v43 = vpack.c.bf16 %v1555_v51, %v1554_v39 }
 0x489   : > { %2079 = vmatpush.bf16.msra.mxu0 %v2952_v1 }
 0x48b   : > { %v1524_v2 = vpop.f32.mrf.mxu0 }
 0x48c   : > { %v1545_v40 = vadd.f32 %v1524_v2, %v4189_v27  ;;  %v2960_v2 = vld [vmem:[#allocation13 + $0x30] sm:$0xff] }
 0x48d   : > { %2080 = vmatpush.bf16.msra.mxu0 %v2951_v0  ;;  %1934 = vmatpush.bf16.msra.mxu1 %v2960_v2  ;;  %v2948_v27 = vld [vmem:[#allocation11 + $0x10] sm:$0xff] }
 0x48e   : > { %v1561_v34 = vmax.f32 %v1545_v40, 0.0  ;;  %v2928_v40 = vld [vmem:[%s3990_s15 + $0x30] sm:$0xff] }
 0x490   : > { %v1570_v44 = vpack.c.bf16 %v1561_v34, %v1560_v48  ;;  %v2938_v34 = vld [vmem:[%s3737_s2] sm:$0xff]  ;;  %v2929_v48 = vld [vmem:[%s3990_s15 + $0x38] sm:$0xff]  ;;  %s3351_s15 = scalar_lea.hbm %s3350_s25, 8 }
 0x491   : > { %p3352_p13 = scmp.ne.s32.totalorder %s3350_s25, %s3351_s15 }
 0x493   : > { %v1527_v4 = vpop.f32.mrf.mxu0  ;;  %p3353_p0 = pnand %p3352_p13, %p3623_p5 }
 0x494   : > { %v1546_v6 = vadd.f32 %v1527_v4, %v4188_v45  ;;  %v2950_v4 = vld [vmem:[#allocation11 + $0x20] sm:$0xff]  ;;  %v2959_v45 = vld [vmem:[#allocation13 + $0x28] sm:$0xff] }
 0x495   : > { %2081 = vmatpush.bf16.msra.mxu0 %v2950_v4  ;;  %1935 = vmatpush.bf16.msra.mxu1 %v2959_v45  ;;  %p3354_p2 = pneg %p3353_p0 }
 0x496   : > { %v1562_v31 = vmax.f32 %v1546_v6, 0.0  ;;  %v2949_v6 = vld [vmem:[#allocation11 + $0x18] sm:$0xff] }
 0x499   : > { %2082 = vmatpush.bf16.msra.mxu0 %v2949_v6 }
 0x49b   : > { %v1529_v11 = vpop.f32.mrf.mxu0 }
 0x49c   : > { %v1547_v38 = vadd.f32 %v1529_v11, %v3787_v28  ;;  %v1558_v28 = vmax.f32 %v1542_v35, 0.0  ;;  %v2958_v11 = vld [vmem:[#allocation13 + $0x20] sm:$0xff] }
 0x49d   : > { %1936 = vmatpush.bf16.msra.mxu1 %v2958_v11  ;;  %2083 = vmatpush.bf16.msra.mxu0 %v2948_v27  ;;  %v2954_v35 = vld [vmem:[#allocation13] sm:$0xff] }
 0x49e   : > { %v1563_v46 = vmax.f32 %v1547_v38, 0.0  ;;  %v1569_v19 = vpack.c.bf16 %v1559_v52, %v1558_v28  ;;  %v2937_v38 = vld [vmem:[%s3743_s9 + $0x38] sm:$0xff]  ;;  %s2511_s9 = sshll.u32 %s3734_s7, 3 }
 0x49f   : > { %s4017_s23 = scalar_lea.vmem [#allocation17], %s2511_s9 }
 0x4a0   : > { %v1571_v32 = vpack.c.bf16 %v1563_v46, %v1562_v31  ;;  %v2947_v31 = vld [vmem:[#allocation11 + $0x8] sm:$0xff]  ;;  %v2956_v46 = vld [vmem:[#allocation13 + $0x10] sm:$0xff]  ;;  %s2228_s21 = sshll.u32 %s4017_s23, 4  ;;  %s2229_s21 = int_to_ptr.vmem [resolvable:$true] %s2228_s21 }
 0x4a1   : > { %1937 = vmatpush.bf16.msra.mxu1 %v2957_v29  ;;  %2084 = vmatpush.bf16.msra.mxu0 %v2947_v31 }
 0x4a2   : > { %1573 = vmatpush.bf16.msra.mxu2 %v1571_v32  ;;  %1667 = vmatpush.bf16.msra.mxu3 %v1571_v32  ;;  %v2955_v32 = vld [vmem:[#allocation13 + $0x8] sm:$0xff] }
 0x4a5   : > { %1938 = vmatpush.bf16.msra.mxu1 %v2956_v46  ;;  %2085 = vmatpush.bf16.msra.mxu0 %v2946_v47 }
 0x4a6   : > { %1574 = vmatpush.bf16.msra.mxu2 %v1570_v44  ;;  %1668 = vmatpush.bf16.msra.mxu3 %v1570_v44  ;;  %v2939_v44 = vld [vmem:[%s3737_s2 + $0x8] sm:$0xff] }
 0x4a8   : > { %2086 = vmatmul.bf16.vlgmr.msra.gmra.mxu0 %v2938_v34 }
 0x4a9   : > { %1939 = vmatpush.bf16.msra.mxu1 %v2955_v32 }
 0x4aa   : > { %1575 = vmatpush.bf16.msra.mxu2 %v1569_v19  ;;  %1669 = vmatpush.bf16.msra.mxu3 %v1569_v19  ;;  %v2940_v19 = vld [vmem:[%s3737_s2 + $0x10] sm:$0xff] }
 0x4ad   : > { %1940 = vmatpush.bf16.msra.mxu1 %v2954_v35 }
 0x4ae   : > { %1576 = vmatpush.bf16.msra.mxu2 %v1568_v42  ;;  %1670 = vmatpush.bf16.msra.mxu3 %v1568_v42 }
 0x4b2   : > { %1577 = vmatpush.bf16.msra.mxu2 %v1567_v43  ;;  %1671 = vmatpush.bf16.msra.mxu3 %v1567_v43 }
 0x4b6   : > { %1578 = vmatpush.bf16.msra.mxu2 %v1566_v36  ;;  %1672 = vmatpush.bf16.msra.mxu3 %v1566_v36 }
 0x4b8   : > { %2091 = vmatmul.bf16.gmra.mxu0 %v2939_v44 }
 0x4ba   : > { %1579 = vmatpush.bf16.msra.mxu2 %v1565_v5  ;;  %1673 = vmatpush.bf16.msra.mxu3 %v1565_v5 }
 0x4be   : > { %1580 = vmatpush.bf16.msra.mxu2 %v1564_v18  ;;  %1674 = vmatpush.bf16.msra.mxu3 %v1564_v18 }
 0x4c1   : > { %1581 = vmatmul.bf16.vlgmr.msra.gmra.mxu2 %v1572_v16  ;;  %1675 = vmatmul.bf16.vlgmr.msra.gmra.mxu3 %v2930_v20  ;;  %v2943_v16 = vld [vmem:[%s3737_s2 + $0x28] sm:$0xff] }
 0x4c2   : > { %1787 = vmatpush.bf16.msrb.mxu2 %v4190_v9 }
 0x4c8   : > { %2096 = vmatmul.bf16.gmra.mxu0 %v2940_v19  ;;  %v4027_v19 = vld [vmem:[#allocation14] ss:$0 sm:$0xff] }
 0x4d1   : > { %2759 = vmatmul.msk.bf16.vlgmr.msrb.gmra.mxu2 %vm1046_vm0, %v2922_v10  ;;  %1680 = vmatmul.bf16.gmra.mxu3 %v2931_v8 }
 0x4d8   : > { %2101 = vmatmul.bf16.gmra.mxu0 %v2941_v41 }
 0x4e1   : > { %2760 = vmatmul.msk.bf16.gmra.mxu2 %vm1046_vm0, %v2923_v13  ;;  %1685 = vmatmul.bf16.gmra.mxu3 %v2932_v12 }
 0x4e8   : > { %2106 = vmatmul.bf16.gmra.mxu0 %v2942_v24 }
 0x4f1   : > { %2761 = vmatmul.msk.bf16.gmra.mxu2 %vm1046_vm0, %v2924_v14  ;;  %1690 = vmatmul.bf16.gmra.mxu3 %v2933_v55 }
 0x4f8   : > { %2111 = vmatmul.bf16.gmra.mxu0 %v2943_v16 }
 0x501   : > { %2762 = vmatmul.msk.bf16.gmra.mxu2 %vm1046_vm0, %v2925_v7  ;;  %1695 = vmatmul.bf16.gmra.mxu3 %v2934_v57  ;;  %v2944_v7 = vld [vmem:[%s3737_s2 + $0x30] sm:$0xff]  ;;  %s2880_s2 = sshll.u32 %s3755_s28, 3  ;;  %s2199_s28 = scalar_lea.sflag [#allocation18], %s3734_s7 }
 0x502   : > { %s775_s29 = scalar_lea.vmem %s4192_s30, %s2880_s2 }
 0x508   : > { %2116 = vmatmul.bf16.gmra.mxu0 %v2944_v7 }
 0x511   : > { %2763 = vmatmul.msk.bf16.gmra.mxu2 %vm1046_vm0, %v2926_v58  ;;  %1700 = vmatmul.bf16.gmra.mxu3 %v2935_v59 }
 0x518   : > { %2121 = vmatmul.bf16.gmra.mxu0 %v2945_v62 }
 0x521   : > { %2764 = vmatmul.msk.bf16.gmra.mxu2 %vm1046_vm0, %v2927_v60  ;;  %1705 = vmatmul.bf16.gmra.mxu3 %v2936_v3 }
 0x525   : > { %v2087_v46 = vpop.f32.mrf.mxu0 }
 0x52d   : > { %v2089_v32 = vpop.f32.mrf.mxu0 }
 0x531   : > { %2765 = vmatmul.msk.bf16.gmra.mxu2 %vm1046_vm0, %v2928_v40  ;;  %1710 = vmatmul.bf16.gmra.mxu3 %v2937_v38 }
 0x541   : > { %2766 = vmatmul.msk.bf16.gmra.mxu2 %vm1046_vm0, %v2929_v48 }
 0x544   : > { %v1582_v33 = vpop.f32.mrf.mxu2  ;;  %v1676_v52 = vpop.f32.mrf.mxu3 }
 0x545   : > { %1586 = vst [vmem:[%s4017_s23] sm:$0xff] %v1582_v33  ;;  %s3355_s23 = scalar_lea.hbm %s4195_s17, 16 }
 0x546   : > { %p3357_p10 = scmp.lt.s32.totalorder %s3355_s23, %s3351_s15 }
 0x548   : > { %p3358_p1 = por %p3357_p10, %p3356_p6 }
 0x54a   : > { %p3359_p4 = pnand %p3358_p1, %p3354_p2 }
 0x54c   : > { %v1584_v49 = vpop.f32.mrf.mxu2  ;;  %v1678_v28 = vpop.f32.mrf.mxu3 }
 0x54d   : > { %v2092_v49 = vpop.f32.mrf.mxu0 }
 0x554   : > { %v1789_v21 = vpop.f32.mrf.mxu2  ;;  %v1681_v53 = vpop.f32.mrf.mxu3 }
 0x555   : > { %v1790_v17 = vadd.f32 %v1789_v21, %v1676_v52  ;;  %v2094_v21 = vpop.f32.mrf.mxu0 }
 0x55c   : > { %v1791_v15 = vpop.f32.mrf.mxu2  ;;  %v1683_v54 = vpop.f32.mrf.mxu3 }
 0x55d   : > { %v1792_v51 = vadd.f32 %v1791_v15, %v1678_v28 }
 0x55f   : > { %v1861_v42 = vpack.c.bf16 %v1792_v51, %v1790_v17  ;;  %v2097_v51 = vpop.f32.mrf.mxu0 }
 0x561   : > { %1941 = vmatmul.bf16.vlgmr.msra.gmra.mxu1 %v1861_v42 }
 0x564   : > { %v1794_v56 = vpop.f32.mrf.mxu2  ;;  %v1686_v39 = vpop.f32.mrf.mxu3 }
 0x565   : > { %v1795_v25 = vadd.f32 %v1794_v56, %v1681_v53 }
 0x56c   : > { %v1796_v37 = vpop.f32.mrf.mxu2  ;;  %v1688_v43 = vpop.f32.mrf.mxu3 }
 0x56d   : > { %v1797_v30 = vadd.f32 %v1796_v37, %v1683_v54 }
 0x56f   : > { %v1862_v26 = vpack.c.bf16 %v1797_v30, %v1795_v25  ;;  %v2099_v25 = vpop.f32.mrf.mxu0 }
 0x571   : > { %1946 = vmatmul.bf16.gmra.mxu1 %v1862_v26 }
 0x574   : > { %v1799_v50 = vpop.f32.mrf.mxu2  ;;  %v1691_v36 = vpop.f32.mrf.mxu3 }
 0x575   : > { %v1800_v5 = vadd.f32 %v1799_v50, %v1686_v39 }
 0x57c   : > { %v1801_v63 = vpop.f32.mrf.mxu2  ;;  %v1693_v22 = vpop.f32.mrf.mxu3 }
 0x57d   : > { %v1802_v23 = vadd.f32 %v1801_v63, %v1688_v43 }
 0x57f   : > { %v1863_v18 = vpack.c.bf16 %v1802_v23, %v1800_v5 }
 0x581   : > { %1951 = vmatmul.bf16.gmra.mxu1 %v1863_v18 }
 0x584   : > { %v1804_v20 = vpop.f32.mrf.mxu2  ;;  %v1696_v9 = vpop.f32.mrf.mxu3 }
 0x585   : > { %v1805_v8 = vadd.f32 %v1804_v20, %v1691_v36 }
 0x58c   : > { %v1806_v10 = vpop.f32.mrf.mxu2  ;;  %v1698_v14 = vpop.f32.mrf.mxu3 }
 0x58d   : > { %v1807_v13 = vadd.f32 %v1806_v10, %v1693_v22  ;;  %v2102_v22 = vpop.f32.mrf.mxu0 }
 0x58f   : > { %v1864_v12 = vpack.c.bf16 %v1807_v13, %v1805_v8 }
 0x591   : > { %1956 = vmatmul.bf16.gmra.mxu1 %v1864_v12 }
 0x594   : > { %v1809_v55 = vpop.f32.mrf.mxu2  ;;  %v1701_v57 = vpop.f32.mrf.mxu3 }
 0x595   : > { %v1810_v59 = vadd.f32 %v1809_v55, %v1696_v9  ;;  %v2104_v16 = vpop.f32.mrf.mxu0 }
 0x59c   : > { %v1811_v58 = vpop.f32.mrf.mxu2  ;;  %v1703_v60 = vpop.f32.mrf.mxu3 }
 0x59d   : > { %v1812_v61 = vadd.f32 %v1811_v58, %v1698_v14 }
 0x59f   : > { %v1865_v1 = vpack.c.bf16 %v1812_v61, %v1810_v59 }
 0x5a1   : > { %1961 = vmatmul.bf16.gmra.mxu1 %v1865_v1 }
 0x5a4   : > { %v1814_v3 = vpop.f32.mrf.mxu2  ;;  %v1706_v45 = vpop.f32.mrf.mxu3 }
 0x5a5   : > { %v1815_v2 = vadd.f32 %v1814_v3, %v1701_v57  ;;  %v2107_v57 = vpop.f32.mrf.mxu0 }
 0x5ac   : > { %v1816_v0 = vpop.f32.mrf.mxu2  ;;  %v1708_v27 = vpop.f32.mrf.mxu3 }
 0x5ad   : > { %v1817_v4 = vadd.f32 %v1816_v0, %v1703_v60  ;;  %v2109_v60 = vpop.f32.mrf.mxu0 }
 0x5af   : > { %v1866_v6 = vpack.c.bf16 %v1817_v4, %v1815_v2 }
 0x5b1   : > { %1966 = vmatmul.bf16.gmra.mxu1 %v1866_v6 }
 0x5b4   : > { %v1819_v11 = vpop.f32.mrf.mxu2  ;;  %v1711_v47 = vpop.f32.mrf.mxu3 }
 0x5b5   : > { %v1820_v38 = vadd.f32 %v1819_v11, %v1706_v45  ;;  %v2112_v45 = vpop.f32.mrf.mxu0 }
 0x5bc   : > { %v1821_v40 = vpop.f32.mrf.mxu2  ;;  %v1713_v35 = vpop.f32.mrf.mxu3 }
 0x5bd   : > { %v1822_v29 = vadd.f32 %v1821_v40, %v1708_v27  ;;  %v2114_v27 = vpop.f32.mrf.mxu0 }
 0x5bf   : > { %v1867_v31 = vpack.c.bf16 %v1822_v29, %v1820_v38 }
 0x5c1   : > { %1971 = vmatmul.bf16.gmra.mxu1 %v1867_v31 }
 0x5c4   : > { %v1824_v34 = vpop.f32.mrf.mxu2 }
 0x5c5   : > { %v1825_v33 = vadd.f32 %v1824_v34, %v1711_v47  ;;  %v2117_v38 = vpop.f32.mrf.mxu0 }
 0x5cc   : > { %v1826_v48 = vpop.f32.mrf.mxu2 }
 0x5cd   : > { %v1827_v52 = vadd.f32 %v1826_v48, %v1713_v35  ;;  %v2119_v31 = vpop.f32.mrf.mxu0 }
 0x5cf   : > { %v1868_v44 = vpack.c.bf16 %v1827_v52, %v1825_v33 }
 0x5d1   : > { %1976 = vmatmul.bf16.gmra.mxu1 %v1868_v44 }
 0x5d5   : > { %v2122_v47 = vpop.f32.mrf.mxu0 }
 0x5dd   : > { %v2124_v48 = vpop.f32.mrf.mxu0 }
 0x5de   : > { %v1942_v28 = vpop.f32.mrf.mxu1 }
 0x5df   : > { %v2088_v53 = vadd.f32 %v2087_v46, %v1942_v28 }
 0x5e1   : > { %v2129_v54 = vadd.f32 %v4027_v19, %v2088_v53 }
 0x5e3   : > { %v2145_v56 = vmax.f32 %v2129_v54, 0.0 }
 0x5e6   : > { %v1944_v15 = vpop.f32.mrf.mxu1 }
 0x5e7   : > { %v2090_v17 = vadd.f32 %v2089_v32, %v1944_v15 }
 0x5e9   : > { %v2130_v42 = vadd.f32 %v4027_v19, %v2090_v17 }
 0x5eb   : > { %v2146_v39 = vmax.f32 %v2130_v42, 0.0 }
 0x5ed   : > { %v4031_v41 = vpack.c.bf16 %v2146_v39, %v2145_v56 }
 0x5ee   : > { %v1947_v37 = vpop.f32.mrf.mxu1 }
 0x5ef   : > { %v2093_v43 = vadd.f32 %v2092_v49, %v1947_v37 }
 0x5f1   : > { %v2131_v26 = vadd.f32 %v4027_v19, %v2093_v43 }
 0x5f3   : > { %v2147_v24 = vmax.f32 %v2131_v26, 0.0 }
 0x5f6   : > { %v1949_v30 = vpop.f32.mrf.mxu1 }
 0x5f7   : > { %v2095_v50 = vadd.f32 %v2094_v21, %v1949_v30 }
 0x5f9   : > { %v2132_v36 = vadd.f32 %v4027_v19, %v2095_v50 }
 0x5fb   : > { %v2148_v63 = vmax.f32 %v2132_v36, 0.0 }
 0x5fd   : > { %v4035_v5 = vpack.c.bf16 %v2148_v63, %v2147_v24 }
 0x5fe   : > { %v1952_v23 = vpop.f32.mrf.mxu1 }
 0x5ff   : > { %v2098_v18 = vadd.f32 %v2097_v51, %v1952_v23 }
 0x601   : > { %v2133_v9 = vadd.f32 %v4027_v19, %v2098_v18 }
 0x603   : > { %v2149_v13 = vmax.f32 %v2133_v9, 0.0 }
 0x606   : > { %v1954_v20 = vpop.f32.mrf.mxu1 }
 0x607   : > { %v2100_v10 = vadd.f32 %v2099_v25, %v1954_v20 }
 0x609   : > { %v2134_v8 = vadd.f32 %v4027_v19, %v2100_v10 }
 0x60b   : > { %v2150_v12 = vmax.f32 %v2134_v8, 0.0 }
 0x60d   : > { %v2163_v14 = vpack.c.bf16 %v2150_v12, %v2149_v13 }
 0x60e   : > { %v1957_v55 = vpop.f32.mrf.mxu1 }
 0x60f   : > { %v2103_v7 = vadd.f32 %v2102_v22, %v1957_v55 }
 0x611   : > { %v2135_v59 = vadd.f32 %v4027_v19, %v2103_v7 }
 0x613   : > { %v2151_v3 = vmax.f32 %v2135_v59, 0.0 }
 0x616   : > { %v1959_v58 = vpop.f32.mrf.mxu1 }
 0x617   : > { %v2105_v61 = vadd.f32 %v2104_v16, %v1959_v58 }
 0x619   : > { %v2136_v1 = vadd.f32 %v4027_v19, %v2105_v61 }
 0x61b   : > { %v2152_v62 = vmax.f32 %v2136_v1, 0.0 }
 0x61d   : > { %v2164_v0 = vpack.c.bf16 %v2152_v62, %v2151_v3 }
 0x61e   : > { %v1962_v2 = vpop.f32.mrf.mxu1 }
 0x61f   : > { %v2108_v4 = vadd.f32 %v2107_v57, %v1962_v2 }
 0x621   : > { %v2137_v36 = vadd.f32 %v4027_v19, %v2108_v4 }
 0x623   : > { %v2153_v23 = vmax.f32 %v2137_v36, 0.0 }
 0x626   : > { %v1964_v6 = vpop.f32.mrf.mxu1 }
 0x627   : > { %v2110_v42 = vadd.f32 %v2109_v60, %v1964_v6 }
 0x629   : > { %v2138_v30 = vadd.f32 %v4027_v19, %v2110_v42 }
 0x62b   : > { %v2154_v63 = vmax.f32 %v2138_v30, 0.0 }
 0x62d   : > { %v2165_v18 = vpack.c.bf16 %v2154_v63, %v2153_v23 }
 0x62e   : > { %v1967_v11 = vpop.f32.mrf.mxu1 }
 0x62f   : > { %v2113_v15 = vadd.f32 %v2112_v45, %v1967_v11 }
 0x631   : > { %v2139_v43 = vadd.f32 %v4027_v19, %v2113_v15 }
 0x633   : > { %v2155_v24 = vmax.f32 %v2139_v43, 0.0 }
 0x636   : > { %v1969_v40 = vpop.f32.mrf.mxu1 }
 0x637   : > { %v2115_v28 = vadd.f32 %v2114_v27, %v1969_v40 }
 0x639   : > { %v2140_v56 = vadd.f32 %v4027_v19, %v2115_v28 }
 0x63b   : > { %v2156_v26 = vmax.f32 %v2140_v56, 0.0 }
 0x63d   : > { %v2166_v22 = vpack.c.bf16 %v2156_v26, %v2155_v24 }
 0x63e   : > { %v1972_v29 = vpop.f32.mrf.mxu1 }
 0x63f   : > { %v2118_v52 = vadd.f32 %v2117_v38, %v1972_v29 }
 0x641   : > { %v2141_v54 = vadd.f32 %v4027_v19, %v2118_v52 }
 0x643   : > { %v2157_v25 = vmax.f32 %v2141_v54, 0.0 }
 0x646   : > { %v1974_v46 = vpop.f32.mrf.mxu1 }
 0x647   : > { %v2120_v35 = vadd.f32 %v2119_v31, %v1974_v46 }
 0x649   : > { %v2142_v21 = vadd.f32 %v4027_v19, %v2120_v35 }
 0x64b   : > { %v2158_v39 = vmax.f32 %v2142_v21, 0.0 }
 0x64d   : > { %v2167_v50 = vpack.c.bf16 %v2158_v39, %v2157_v25 }
 0x64e   : > { %v1977_v34 = vpop.f32.mrf.mxu1 }
 0x64f   : > { %v2123_v32 = vadd.f32 %v2122_v47, %v1977_v34 }
 0x651   : > { %v2143_v44 = vadd.f32 %v4027_v19, %v2123_v32 }
 0x653   : > { %v2159_v17 = vmax.f32 %v2143_v44, 0.0 }
 0x656   : > { %v1979_v33 = vpop.f32.mrf.mxu1 }
 0x657   : > { %v2125_v49 = vadd.f32 %v2124_v48, %v1979_v33 }
 0x659   : > { %v2144_v53 = vadd.f32 %v4027_v19, %v2125_v49  ;;  %v2962_v19 = vld [vmem:[%s775_s29] sm:$0xff] }
 0x65b   : > { %v2160_v51 = vmax.f32 %v2144_v53, 0.0 }
 0x65d   : > { %v2168_v37 = vpack.c.bf16 %v2160_v51, %v2159_v17 }
 0x65f   : > { %2177 = vmatpush.bf16.msrb.mxu3 %v2168_v37 }
 0x663   : > { %2178 = vmatpush.bf16.msrb.mxu3 %v2167_v50 }
 0x667   : > { %2179 = vmatpush.bf16.msrb.mxu3 %v2166_v22 }
 0x66b   : > { %2180 = vmatpush.bf16.msrb.mxu3 %v2165_v18 }
 0x66f   : > { %2181 = vmatpush.bf16.msrb.mxu3 %v2164_v0 }
 0x673   : > { %2182 = vmatpush.bf16.msrb.mxu3 %v2163_v14 }
 0x677   : > { %2183 = vmatpush.bf16.msrb.mxu3 %v4035_v5 }
 0x67b   : > { %2184 = vmatpush.bf16.msrb.mxu3 %v4031_v41 }
 0x67e   : > { %2185 = vmatmul.bf16.vlgmr.msrb.gmra.mxu3 %v2962_v19 }
 0x67f   : > { %3362 = shalt.err (!%p3359_p4)
}
 0x680   : > { %3002 = dma.vmem_to_hbm [thread:$0]  (%p3623_p5), %s2229_s21, 128, %s2231_s24, %s2199_s28  }
 0x681   : > { %s2510_s30 = sshll.u32 %s3734_s7, 4  ;;  %s2963_s29 = sshll.u32 %s3562_s22, 4 }
 0x682   : > { %s4196_s20 = sld [smem:[#allocation45_spill]]  ;;  %s743_s9 = scalar_lea.vmem [#allocation16], %s2510_s30 }
 0x683   : > { %s2211_s25 = sshll.u32 %s743_s9, 4  ;;  %s2194_s2 = scalar_lea.sflag [#allocation4], %s3734_s7  ;;  %s2212_s25 = int_to_ptr.vmem [resolvable:$true] %s2211_s25 }
 0x688   : > { %s4197_s26 = smov %s4196_s20  ;;  %s2210_s18 = scalar_lea.hbm %s4196_s20, %s2963_s29 }
 0x689   : > { %s2213_s15 = sshll.u32 %s2210_s18, 4  ;;  %s3383_s28 = scalar_lea.hbm %s4197_s26, 32  ;;  %s2214_s15 = int_to_ptr.hbm [resolvable:$true] %s2213_s15 }
 0x68a   : > { %s3377_s23 = sshra.s32 %s2214_s15, 4  ;;  %s3378_s23 = int_to_ptr.hbm [resolvable:$true] %s3377_s23 }
 0x68b   : > { %s3379_s21 = scalar_lea.hbm %s3378_s23, 16  ;;  %p3384_p12 = scmp.lt.s32.totalorder %s3378_s23, %s4197_s26 }
 0x68c   : > { %p3380_p3 = scmp.ne.s32.totalorder %s3378_s23, %s3379_s21  ;;  %p3385_p11 = scmp.lt.s32.totalorder %s3383_s28, %s3379_s21 }
 0x68e   : > { %p3381_p8 = pnand %p3380_p3, %p3623_p5  ;;  %p3386_p13 = por %p3385_p11, %p3384_p12 }
 0x690   : > { %p3382_p9 = pneg %p3381_p8 }
 0x692   : > { %p3387_p0 = pnand %p3386_p13, %p3382_p9 }
 0x701   : > { %v2186_v41 = vpop.f32.mrf.mxu3 }
 0x702   : > { %2191 = vst [vmem:[%s743_s9] sm:$0xff] %v2186_v41 }
 0x709   : > { %v2188_v5 = vpop.f32.mrf.mxu3 }
 0x70a   : > { %2192 = vst [vmem:[%s743_s9 + $0x8] sm:$0xff] %v2188_v5 }
 0x70b   : > { %3390 = shalt.err (!%p3387_p0)
}
 0x70c   : > { %s3459_s7 = smov 128   ;;  %s3460_s30 = smov 8  }
 0x70d   : > { %3001 = dma.vmem_to_hbm [thread:$0]  (%p3623_p5), %s2212_s25, 256, %s2214_s15, %s2194_s2, %s3459_s7, %s3459_s7, %s3460_s30  }
 0x70e PF: > { %s4198_s29 = sld [smem:[#allocation26_spill]] }
 0x70f   : > { %s4200_s16 = sld [smem:[#allocation28_spill]] }
 0x714   : > { %s2242_s20 = sand.u32 1, %s4198_s29  }
 0x715   : > { %p4201_p2 = scmp.ge.s32.totalorder %s4200_s16, 2  ;;  %s2243_s18 = scalar_lea.sflag [#allocation4], %s2242_s20 }
 0x717   : > { %p3032_p6 = pnand %p4201_p2, %p3627_p7 }
 0x719   : > { %p3033_p10 = pneg %p3032_p6 }
 0x71b   : > { %3428 = dma.done.wait (%p3033_p10), %s2243_s18, 256  }
 0x71c   : > { %3430 = vsyncadd (%p3033_p10), %s2243_s18, 4294967040  ;;  %s2253_s9 = scalar_lea.sflag [#allocation18], %s2242_s20 }
 0x71d   : > { %3432 = dma.done.wait (%p3033_p10), %s2253_s9, 128  }
 0x71e   : > { %3434 = vsyncadd (%p3033_p10), %s2253_s9, 4294967168  ;;  %s4202_s21 = sld [smem:[#allocation29_spill]]  ;;  %s4205_s18 = smov %s3441_s19 }
 0x71f   : > { %s4203_s23 = sld [smem:[#allocation27_spill]] }
 0x720   : > { %s4204_s20 = sld [smem:[#allocation30_spill]] }
 0x724   : > { %p36_p5 = scmp.ge.s32.totalorder %s4202_s21, 4  }
 0x725   : > { %s4206_s19 = smov %s4203_s23 }
 0x726   :  { %38 = sbr.rel (!%p36_p5) target bundleno = 19 (0x13), region = 192 }
 0x72b   :  { %2259 = vsyncpa [#allocation3], 1 }
 0x72c   :  { %2261 = vsyncpa [#allocation3 + $0x1], 1 }
 0x72d   :  { %2262 = vsyncpa [#allocation6], 1 }
 0x72e   :  { %2263 = vsyncpa [#allocation9], 1 }
 0x72f   :  { %2265 = vsyncpa [#allocation9 + $0x1], 1 }
 0x730   :  { %2266 = vsyncpa [#allocation12], 1 }
 0x731   :  { %2267 = vsyncpa [#allocation15], 1 }
 0x732   :  { %2268 = vsyncpa [#allocation4], 1 }
 0x733   :  { %2270 = vsyncpa [#allocation4 + $0x1], 1 }
 0x734   :  { %2271 = vsyncpa [#allocation18], 1 }
 0x735   :  { %2273 = vsyncpa [#allocation18 + $0x1], 1 }

</bundles_post_ra>
